<compile_context>
chip_gen: v6e
topology: v6e:2x2x1
jax: 0.10.0
libtpu: 0.0.40
codegen_flags: <defaults>
</compile_context>

<pallas_src>
import jax
import jax.numpy as jnp
from jax.experimental import pallas as pl
from jax.experimental.pallas import tpu as pltpu


def decoder_kernel(x_ref, wup_ref, bup_ref, w2b_ref, b2_ref, o_ref):
    # x_ref:   (1, H, W*Cin)            input rows, channel-fastest on lanes
    # wup_ref: (W*Cin, 2*W2*Cmid) bf16  block-diag upconv weights (dy=0 | dy=1)
    # bup_ref: (1, 2*W2*Cmid)    f32    upconv bias, tiled to column layout
    # w2b_ref: (3, W2*Cmid, W2*Cout) bf16  banded 3x3-conv weights, one per ky
    # b2_ref:  (1, W2*Cout)      f32    conv bias, tiled to column layout
    # o_ref:   (1, 2, H, W2*Cout)       output, split by row parity
    f32 = jnp.float32
    bf16 = jnp.bfloat16

    x = x_ref[0]                                            # (H, W*Cin) f32

    # ---- ConvTranspose2d(k=2, s=2) + ReLU: one dense matmul -----------------
    y = jnp.dot(x.astype(bf16), wup_ref[...],
                preferred_element_type=f32)                 # (H, 2*W2*Cmid)
    y = jnp.maximum(y + bup_ref[...], 0.0)                  # bias + ReLU in f32

    half = y.shape[1] // 2                                  # = W2*Cmid
    even = y[:, :half].astype(bf16)                         # upsampled rows 2t
    odd = y[:, half:].astype(bf16)                          # upsampled rows 2t+1

    # Row-shifted views for the ky taps (H-direction zero padding).
    zrow = jnp.zeros((1, half), bf16)
    odd_dn = jnp.concatenate([zrow, odd[:-1]], axis=0)      # row 2t-1 (0 at top)
    even_up = jnp.concatenate([even[1:], zrow], axis=0)     # row 2t+2 (0 at bot)

    w_ky0 = w2b_ref[0]
    w_ky1 = w2b_ref[1]
    w_ky2 = w2b_ref[2]
    b2 = b2_ref[...]                                        # (1, W2*Cout) f32

    # ---- Conv2d(3x3, pad=1): banded matmuls, split by output-row parity -----
    # (width padding is already folded into the banded weights)
    out_even = (jnp.dot(odd_dn, w_ky0, preferred_element_type=f32)
                + jnp.dot(even, w_ky1, preferred_element_type=f32)
                + jnp.dot(odd, w_ky2, preferred_element_type=f32)
                + b2)                                       # rows 2t
    out_odd = (jnp.dot(even, w_ky0, preferred_element_type=f32)
               + jnp.dot(odd, w_ky1, preferred_element_type=f32)
               + jnp.dot(even_up, w_ky2, preferred_element_type=f32)
               + b2)                                        # rows 2t+1
    # (no ReLU after conv1 in the reference module)

    o_ref[0, 0, :, :] = out_even.astype(o_ref.dtype)        # dense (H, 128) store
    o_ref[0, 1, :, :] = out_odd.astype(o_ref.dtype)


@jax.jit
def decoder_forward(x, wt, b_up, w2, b2):
    """x: (N, Cin, H, W) NCHW.  wt: (Cin, Cmid, 2, 2) ConvTranspose2d weight.
       b_up: (Cmid,).  w2: (Cout, Cmid, 3, 3) Conv2d weight.  b2: (Cout,)."""
    N, Cin, H, W = x.shape
    Cmid = wt.shape[1]
    Cout = w2.shape[0]
    H2, W2 = 2 * H, 2 * W

    # ---- parameter re-layout (tiny, done once under jit) --------------------
    # Upconv as block-diagonal matmul weights: rows (j, ci), cols (dy | j, dx, c)
    blk = jnp.transpose(wt, (2, 0, 3, 1)).reshape(2, Cin, 2 * Cmid)  # (dy,Cin,(dx,c))
    eye_w = jnp.eye(W, dtype=wt.dtype)
    big = jnp.einsum('jk,dab->djakb', eye_w, blk)
    big = big.reshape(2, W * Cin, W * 2 * Cmid)
    wup = jnp.concatenate([big[0], big[1]], axis=1).astype(jnp.bfloat16)
    bup = jnp.tile(b_up, 2 * W2).reshape(1, 2 * W2 * Cmid).astype(jnp.float32)

    # 3x3 conv as banded matmuls over lane-folded rows:
    # w2b[ky][q_in*Cmid+ci, q_out*Cout+co] = w2[co, ci, ky, q_in-q_out+1]
    q = jnp.arange(W2)
    dx = q[:, None] - q[None, :] + 1                        # (q_in, q_out)
    valid = (dx >= 0) & (dx <= 2)
    dxc = jnp.clip(dx, 0, 2)
    w2r = jnp.transpose(w2, (2, 3, 1, 0))                   # (ky, kx, Cmid, Cout)
    band = jnp.where(valid[None, :, :, None, None], w2r[:, dxc], 0.0)
    w2b = jnp.transpose(band, (0, 1, 3, 2, 4)).reshape(
        3, W2 * Cmid, W2 * Cout).astype(jnp.bfloat16)
    b2row = jnp.tile(b2, W2).reshape(1, W2 * Cout).astype(jnp.float32)

    # Activation layout: NCHW -> (N, H, W*Cin), channel fastest on the lane axis.
    x2d = jnp.transpose(x, (0, 2, 3, 1)).reshape(N, H, W * Cin)

    out = pl.pallas_call(
        decoder_kernel,
        out_shape=jax.ShapeDtypeStruct((N, 2, H, W2 * Cout), jnp.float32),
        grid_spec=pltpu.PrefetchScalarGridSpec(
            num_scalar_prefetch=0,
            grid=(N,),
            in_specs=[
                pl.BlockSpec((1, H, W * Cin), lambda n: (n, 0, 0)),
                pl.BlockSpec((W * Cin, 2 * W2 * Cmid), lambda n: (0, 0)),
                pl.BlockSpec((1, 2 * W2 * Cmid), lambda n: (0, 0)),
                pl.BlockSpec((3, W2 * Cmid, W2 * Cout), lambda n: (0, 0, 0)),
                pl.BlockSpec((1, W2 * Cout), lambda n: (0, 0)),
            ],
            out_specs=pl.BlockSpec((1, 2, H, W2 * Cout),
                                   lambda n: (n, 0, 0, 0)),
        ),
        compiler_params=pltpu.CompilerParams(
            dimension_semantics=("parallel",)),
    )(x2d, wup, bup, w2b, b2row)

    # (N, parity, t, (q, co)) -> NCHW (N, Cout, 2H, 2W); the single transpose
    # also performs the even/odd row de-interleave.
    out = out.reshape(N, 2, H, W2, Cout)
    out = jnp.transpose(out, (0, 4, 2, 1, 3)).reshape(N, Cout, H2, W2)
    return out


def ref_forward(x, wt, b_up, w2, b2):
    """Pure-JAX reference matching the PyTorch Decoder.forward (NCHW, f32)."""
    N, Cin, H, W = x.shape
    Cmid = wt.shape[1]
    # ConvTranspose2d with k=2, s=2 (non-overlapping): per-pixel 2x2 scatter.
    up = jnp.einsum('nchw,cokl->nohkwl', x, wt).reshape(N, Cmid, 2 * H, 2 * W)
    up = jax.nn.relu(up + b_up.reshape(1, -1, 1, 1))
    out = jax.lax.conv_general_dilated(
        up, w2, window_strides=(1, 1), padding=((1, 1), (1, 1)),
        dimension_numbers=('NCHW', 'OIHW', 'NCHW'))
    return out + b2.reshape(1, -1, 1, 1)


if __name__ == "__main__":
    # Decoder(in_channels=16, out_channels=8) on a (2, 16, 8, 8) input
    # -> output (2, 8, 16, 16).
    N, Cin, H, W = 2, 16, 8, 8
    Cmid, Cout = Cin // 2, 8

    key = jax.random.PRNGKey(0)
    kx, k1, k2, k3, k4 = jax.random.split(key, 5)
    x = jax.random.normal(kx, (N, Cin, H, W), jnp.float32)
    wt = 0.1 * jax.random.normal(k1, (Cin, Cmid, 2, 2), jnp.float32)   # upconv1.weight
    b_up = 0.1 * jax.random.normal(k2, (Cmid,), jnp.float32)           # upconv1.bias
    w2 = 0.1 * jax.random.normal(k3, (Cout, Cmid, 3, 3), jnp.float32)  # conv1.weight
    b2 = 0.1 * jax.random.normal(k4, (Cout,), jnp.float32)             # conv1.bias

    out = decoder_forward(x, wt, b_up, w2, b2)
    out = jax.block_until_ready(out)

    ref = ref_forward(x, wt, b_up, w2, b2)
    assert out.shape == (N, Cout, 2 * H, 2 * W), out.shape
    max_err = float(jnp.max(jnp.abs(out - ref)))
    # bf16 MXU operands (f32 accumulation) -> loosened tolerance vs. f32 ref.
    assert jnp.allclose(out, ref, atol=5e-2, rtol=5e-2), max_err

    print("KERNEL_OK")
</pallas_src>

<mosaic_0001>
module attributes {stable_mosaic.version = 11 : i64} {
  func.func @decoder_kernel(%arg0: i32, %arg1: memref<1x8x128xf32, #tpu.memory_space<vmem>>, %arg2: memref<128x256xbf16, #tpu.memory_space<vmem>>, %arg3: memref<1x256xf32, #tpu.memory_space<vmem>>, %arg4: memref<3x128x128xbf16, #tpu.memory_space<vmem>>, %arg5: memref<1x128xf32, #tpu.memory_space<vmem>>, %arg6: memref<1x2x8x128xf32, #tpu.memory_space<vmem>>) attributes {dimension_semantics = [#tpu.dimension_semantics<parallel>], iteration_bounds = array<i64: 2>, scalar_prefetch = 0 : i64, scratch_operands = 0 : i64, tpu.core_type = #tpu.core_type<tc>, window_params = [{transform_indices = @transform_0, window_bounds = array<i64: 1, 8, 128>}, {pipeline_mode = #tpu.pipeline_mode<synchronous>, transform_indices = @transform_1, window_bounds = array<i64: 128, 256>}, {pipeline_mode = #tpu.pipeline_mode<synchronous>, transform_indices = @transform_2, window_bounds = array<i64: 1, 256>}, {pipeline_mode = #tpu.pipeline_mode<synchronous>, transform_indices = @transform_3, window_bounds = array<i64: 3, 128, 128>}, {pipeline_mode = #tpu.pipeline_mode<synchronous>, transform_indices = @transform_4, window_bounds = array<i64: 1, 128>}, {transform_indices = @transform_5, window_bounds = array<i64: 1, 2, 8, 128>}]} {
    %c0 = arith.constant 0 : index
    %c0_0 = arith.constant 0 : index
    %c0_1 = arith.constant 0 : index
    %0 = vector.load %arg1[%c0, %c0_0, %c0_1] : memref<1x8x128xf32, #tpu.memory_space<vmem>>, vector<1x8x128xf32>
    %1 = vector.shape_cast %0 : vector<1x8x128xf32> to vector<8x128xf32>
    %2 = arith.truncf %1 : vector<8x128xf32> to vector<8x128xbf16>
    %c0_2 = arith.constant 0 : index
    %c0_3 = arith.constant 0 : index
    %3 = vector.load %arg2[%c0_2, %c0_3] : memref<128x256xbf16, #tpu.memory_space<vmem>>, vector<128x256xbf16>
    %cst = arith.constant dense<0.000000e+00> : vector<8x256xf32>
    %4 = tpu.matmul %2, %3, %cst {dimension_numbers = #tpu.dot_dimension_numbers<[1], [0], [0], [1], [0, 0, 1, 1], [], []>} : vector<8x128xbf16>, vector<128x256xbf16>, vector<8x256xf32> -> vector<8x256xf32>
    %c0_4 = arith.constant 0 : index
    %c0_5 = arith.constant 0 : index
    %5 = vector.load %arg3[%c0_4, %c0_5] : memref<1x256xf32, #tpu.memory_space<vmem>>, vector<1x256xf32>
    %6 = vector.broadcast %5 : vector<1x256xf32> to vector<8x256xf32>
    %7 = arith.addf %4, %6 : vector<8x256xf32>
    %cst_6 = arith.constant 0.000000e+00 : f32
    %8 = vector.broadcast %cst_6 : f32 to vector<8x256xf32>
    %9 = arith.maximumf %7, %8 : vector<8x256xf32>
    %10 = vector.extract_strided_slice %9 {offsets = [0, 0], sizes = [8, 128], strides = [1, 1]} : vector<8x256xf32> to vector<8x128xf32>
    %11 = arith.truncf %10 : vector<8x128xf32> to vector<8x128xbf16>
    %12 = vector.extract_strided_slice %9 {offsets = [0, 128], sizes = [8, 128], strides = [1, 1]} : vector<8x256xf32> to vector<8x128xf32>
    %13 = arith.truncf %12 : vector<8x128xf32> to vector<8x128xbf16>
    %cst_7 = arith.constant 0.000000e+00 : bf16
    %14 = vector.broadcast %cst_7 : bf16 to vector<1x128xbf16>
    %15 = vector.extract_strided_slice %13 {offsets = [0, 0], sizes = [7, 128], strides = [1, 1]} : vector<8x128xbf16> to vector<7x128xbf16>
    %16 = tpu.concatenate %14, %15 in 0 : vector<1x128xbf16>, vector<7x128xbf16> -> vector<8x128xbf16>
    %17 = vector.extract_strided_slice %11 {offsets = [1, 0], sizes = [7, 128], strides = [1, 1]} : vector<8x128xbf16> to vector<7x128xbf16>
    %18 = tpu.concatenate %17, %14 in 0 : vector<7x128xbf16>, vector<1x128xbf16> -> vector<8x128xbf16>
    %c0_8 = arith.constant 0 : index
    %c0_9 = arith.constant 0 : index
    %c0_10 = arith.constant 0 : index
    %19 = vector.load %arg4[%c0_8, %c0_9, %c0_10] : memref<3x128x128xbf16, #tpu.memory_space<vmem>>, vector<1x128x128xbf16>
    %20 = vector.shape_cast %19 : vector<1x128x128xbf16> to vector<128x128xbf16>
    %c1 = arith.constant 1 : index
    %c0_11 = arith.constant 0 : index
    %c0_12 = arith.constant 0 : index
    %21 = vector.load %arg4[%c1, %c0_11, %c0_12] : memref<3x128x128xbf16, #tpu.memory_space<vmem>>, vector<1x128x128xbf16>
    %22 = vector.shape_cast %21 : vector<1x128x128xbf16> to vector<128x128xbf16>
    %c2 = arith.constant 2 : index
    %c0_13 = arith.constant 0 : index
    %c0_14 = arith.constant 0 : index
    %23 = vector.load %arg4[%c2, %c0_13, %c0_14] : memref<3x128x128xbf16, #tpu.memory_space<vmem>>, vector<1x128x128xbf16>
    %24 = vector.shape_cast %23 : vector<1x128x128xbf16> to vector<128x128xbf16>
    %c0_15 = arith.constant 0 : index
    %c0_16 = arith.constant 0 : index
    %25 = vector.load %arg5[%c0_15, %c0_16] : memref<1x128xf32, #tpu.memory_space<vmem>>, vector<1x128xf32>
    %cst_17 = arith.constant dense<0.000000e+00> : vector<8x128xf32>
    %26 = tpu.matmul %16, %20, %cst_17 {dimension_numbers = #tpu.dot_dimension_numbers<[1], [0], [0], [1], [0, 0, 1, 1], [], []>} : vector<8x128xbf16>, vector<128x128xbf16>, vector<8x128xf32> -> vector<8x128xf32>
    %cst_18 = arith.constant dense<0.000000e+00> : vector<8x128xf32>
    %27 = tpu.matmul %11, %22, %cst_18 {dimension_numbers = #tpu.dot_dimension_numbers<[1], [0], [0], [1], [0, 0, 1, 1], [], []>} : vector<8x128xbf16>, vector<128x128xbf16>, vector<8x128xf32> -> vector<8x128xf32>
    %28 = arith.addf %26, %27 : vector<8x128xf32>
    %cst_19 = arith.constant dense<0.000000e+00> : vector<8x128xf32>
    %29 = tpu.matmul %13, %24, %cst_19 {dimension_numbers = #tpu.dot_dimension_numbers<[1], [0], [0], [1], [0, 0, 1, 1], [], []>} : vector<8x128xbf16>, vector<128x128xbf16>, vector<8x128xf32> -> vector<8x128xf32>
    %30 = arith.addf %28, %29 : vector<8x128xf32>
    %31 = vector.broadcast %25 : vector<1x128xf32> to vector<8x128xf32>
    %32 = arith.addf %30, %31 : vector<8x128xf32>
    %cst_20 = arith.constant dense<0.000000e+00> : vector<8x128xf32>
    %33 = tpu.matmul %11, %20, %cst_20 {dimension_numbers = #tpu.dot_dimension_numbers<[1], [0], [0], [1], [0, 0, 1, 1], [], []>} : vector<8x128xbf16>, vector<128x128xbf16>, vector<8x128xf32> -> vector<8x128xf32>
    %cst_21 = arith.constant dense<0.000000e+00> : vector<8x128xf32>
    %34 = tpu.matmul %13, %22, %cst_21 {dimension_numbers = #tpu.dot_dimension_numbers<[1], [0], [0], [1], [0, 0, 1, 1], [], []>} : vector<8x128xbf16>, vector<128x128xbf16>, vector<8x128xf32> -> vector<8x128xf32>
    %35 = arith.addf %33, %34 : vector<8x128xf32>
    %cst_22 = arith.constant dense<0.000000e+00> : vector<8x128xf32>
    %36 = tpu.matmul %18, %24, %cst_22 {dimension_numbers = #tpu.dot_dimension_numbers<[1], [0], [0], [1], [0, 0, 1, 1], [], []>} : vector<8x128xbf16>, vector<128x128xbf16>, vector<8x128xf32> -> vector<8x128xf32>
    %37 = arith.addf %35, %36 : vector<8x128xf32>
    %38 = vector.broadcast %25 : vector<1x128xf32> to vector<8x128xf32>
    %39 = arith.addf %37, %38 : vector<8x128xf32>
    %c0_23 = arith.constant 0 : index
    %c0_24 = arith.constant 0 : index
    %c0_25 = arith.constant 0 : index
    %c0_26 = arith.constant 0 : index
    %40 = vector.load %arg6[%c0_23, %c0_24, %c0_25, %c0_26] : memref<1x2x8x128xf32, #tpu.memory_space<vmem>>, vector<1x1x8x128xf32>
    %41 = vector.shape_cast %40 : vector<1x1x8x128xf32> to vector<8x128xf32>
    %42 = vector.shape_cast %32 : vector<8x128xf32> to vector<1x1x8x128xf32>
    tpu.vector_store %arg6[%c0_23, %c0_24, %c0_25, %c0_26], %42 {strides = array<i32>} : memref<1x2x8x128xf32, #tpu.memory_space<vmem>>, vector<1x1x8x128xf32>,
    %c0_27 = arith.constant 0 : index
    %c1_28 = arith.constant 1 : index
    %c0_29 = arith.constant 0 : index
    %c0_30 = arith.constant 0 : index
    %43 = vector.load %arg6[%c0_27, %c1_28, %c0_29, %c0_30] : memref<1x2x8x128xf32, #tpu.memory_space<vmem>>, vector<1x1x8x128xf32>
    %44 = vector.shape_cast %43 : vector<1x1x8x128xf32> to vector<8x128xf32>
    %45 = vector.shape_cast %39 : vector<8x128xf32> to vector<1x1x8x128xf32>
    tpu.vector_store %arg6[%c0_27, %c1_28, %c0_29, %c0_30], %45 {strides = array<i32>} : memref<1x2x8x128xf32, #tpu.memory_space<vmem>>, vector<1x1x8x128xf32>,
    return
  }
  func.func @transform_0(%arg0: i32) -> (i32, i32, i32) {
    %c0_i32 = arith.constant 0 : i32
    %c0_i32_0 = arith.constant 0 : i32
    %c0_i32_1 = arith.constant 0 : i32
    return %arg0, %c0_i32, %c0_i32_0 : i32, i32, i32
  }
  func.func @transform_1(%arg0: i32) -> (i32, i32) {
    %c0_i32 = arith.constant 0 : i32
    %c0_i32_0 = arith.constant 0 : i32
    %c0_i32_1 = arith.constant 0 : i32
    return %c0_i32, %c0_i32_0 : i32, i32
  }
  func.func @transform_2(%arg0: i32) -> (i32, i32) {
    %c0_i32 = arith.constant 0 : i32
    %c0_i32_0 = arith.constant 0 : i32
    %c0_i32_1 = arith.constant 0 : i32
    return %c0_i32, %c0_i32_0 : i32, i32
  }
  func.func @transform_3(%arg0: i32) -> (i32, i32, i32) {
    %c0_i32 = arith.constant 0 : i32
    %c0_i32_0 = arith.constant 0 : i32
    %c0_i32_1 = arith.constant 0 : i32
    %c0_i32_2 = arith.constant 0 : i32
    return %c0_i32, %c0_i32_0, %c0_i32_1 : i32, i32, i32
  }
  func.func @transform_4(%arg0: i32) -> (i32, i32) {
    %c0_i32 = arith.constant 0 : i32
    %c0_i32_0 = arith.constant 0 : i32
    %c0_i32_1 = arith.constant 0 : i32
    return %c0_i32, %c0_i32_0 : i32, i32
  }
  func.func @transform_5(%arg0: i32) -> (i32, i32, i32, i32) {
    %c0_i32 = arith.constant 0 : i32
    %c0_i32_0 = arith.constant 0 : i32
    %c0_i32_1 = arith.constant 0 : i32
    %c0_i32_2 = arith.constant 0 : i32
    return %arg0, %c0_i32, %c0_i32_0, %c0_i32_1 : i32, i32, i32, i32
  }
}

</mosaic_0001>

<bundles_post_ra>
// kernel: squeeze.1
= control target key start
LH: loop header
LB: loop body
LE: loop exit
PB: predicated region body
PF: predicated region fallthrough
CT: control target
= control target key end

     0   :  { %vm2052_vm0 = vcmask 1047556   ;;  %s4480_s18 = smov 112   ;;  %s4483_s21 = smov 64   ;;  %vm2054_vm1 = vcmask 130048   ;;  %vm2199_vm2 = vcmask 1048448   ;;  %vm2374_vm3 = vcmask 917248   ;;  %s5025_s0 = inlined_call_operand.vmem [shape: bf16[1,8,16,8,16], index: 0, kind: input, shape index: {}]   ;;  %s5026_s1 = inlined_call_operand.vmem [shape: bf16[128,128], index: 1, kind: output, shape index: {}]  }
   0x1   :  { %v4167_v0 = vld [vmem:[%s5025_s0 + $0x98] sm:$0xff]   ;;  %v4168_v1 = vld [vmem:[%s5025_s0 + $0x90] sm:$0xff]   ;;  %v4169_v2 = vld [vmem:[%s5025_s0 + $0x88] sm:$0xff]   ;;  %s4484_s22 = smov 48   ;;  %s4485_s23 = smov 32   ;;  %vm2549_vm4 = vcmask 786048  }
   0x2   :  { %v4005_v3 = vunpack.c.l.bf16 %v4167_v0  ;;  %v4006_v4 = vunpack.c.h.bf16 %v4167_v0  ;;  %v4009_v5 = vunpack.c.l.bf16 %v4168_v1  ;;  %v4010_v6 = vunpack.c.h.bf16 %v4168_v1  ;;  %v4170_v7 = vld [vmem:[%s5025_s0 + $0x80] sm:$0xff]   ;;  %v4183_v8 = vld [vmem:[%s5025_s0 + $0x18] sm:$0xff]   ;;  %v4184_v9 = vld [vmem:[%s5025_s0 + $0x10] sm:$0xff]   ;;  %s4486_s24 = smov 16  }
   0x3   :  { %v4013_v10 = vunpack.c.l.bf16 %v4169_v2  ;;  %v4014_v11 = vunpack.c.h.bf16 %v4169_v2  ;;  %v4017_v12 = vunpack.c.l.bf16 %v4170_v7  ;;  %v4018_v13 = vunpack.c.h.bf16 %v4170_v7  ;;  %v4185_v14 = vld [vmem:[%s5025_s0 + $0x8] sm:$0xff]   ;;  %v4080_v15 = vld [vmem:[%s5025_s0] sm:$0xff]   ;;  %v4163_v16 = vld [vmem:[%s5025_s0 + $0xb8] sm:$0xff]  }
   0x4   :  { %1429 = vst [vmem:[#allocation1 + $0x138] sm:$0xff] %v4006_v4  ;;  %1445 = vst [vmem:[#allocation1 + $0x130] sm:$0xff] %v4005_v3  ;;  %v4069_v17 = vunpack.c.l.bf16 %v4183_v8  ;;  %v4070_v18 = vunpack.c.h.bf16 %v4183_v8  ;;  %v4073_v19 = vunpack.c.l.bf16 %v4184_v9  ;;  %v4074_v20 = vunpack.c.h.bf16 %v4184_v9  ;;  %v4164_v21 = vld [vmem:[%s5025_s0 + $0xb0] sm:$0xff]   ;;  %v4165_v22 = vld [vmem:[%s5025_s0 + $0xa8] sm:$0xff]  }
   0x5   :  { %1461 = vst [vmem:[#allocation1 + $0x128] sm:$0xff] %v4010_v6  ;;  %1477 = vst [vmem:[#allocation1 + $0x120] sm:$0xff] %v4009_v5  ;;  %v4166_v23 = vld [vmem:[%s5025_s0 + $0xa0] sm:$0xff]   ;;  %v4077_v24 = vunpack.c.l.bf16 %v4185_v14  ;;  %v4078_v25 = vunpack.c.h.bf16 %v4185_v14  ;;  %v4081_v26 = vunpack.c.l.bf16 %v4080_v15  ;;  %v4082_v27 = vunpack.c.h.bf16 %v4080_v15  ;;  %v4179_v28 = vld [vmem:[%s5025_s0 + $0x38] sm:$0xff]  }
   0x6   :  { %1493 = vst [vmem:[#allocation1 + $0x118] sm:$0xff] %v4014_v11  ;;  %1509 = vst [vmem:[#allocation1 + $0x110] sm:$0xff] %v4013_v10  ;;  %v4180_v29 = vld [vmem:[%s5025_s0 + $0x30] sm:$0xff]   ;;  %v3989_v30 = vunpack.c.l.bf16 %v4163_v16  ;;  %v3990_v31 = vunpack.c.h.bf16 %v4163_v16  ;;  %v3993_v32 = vunpack.c.l.bf16 %v4164_v21  ;;  %v3994_v33 = vunpack.c.h.bf16 %v4164_v21  ;;  %v4181_v34 = vld [vmem:[%s5025_s0 + $0x28] sm:$0xff]  }
   0x7   :  { %1525 = vst [vmem:[#allocation1 + $0x108] sm:$0xff] %v4018_v13  ;;  %1541 = vst [vmem:[#allocation1 + $0x100] sm:$0xff] %v4017_v12  ;;  %v4182_v35 = vld [vmem:[%s5025_s0 + $0x20] sm:$0xff]   ;;  %v3997_v36 = vunpack.c.l.bf16 %v4165_v22  ;;  %v3998_v37 = vunpack.c.h.bf16 %v4165_v22  ;;  %v4001_v38 = vunpack.c.l.bf16 %v4166_v23  ;;  %v4002_v39 = vunpack.c.h.bf16 %v4166_v23  ;;  %v4135_v40 = vld [vmem:[%s5025_s0 + $0x198] sm:$0xff]  }
   0x8   :  { %1941 = vst [vmem:[#allocation1 + $0x38] sm:$0xff] %v4070_v18  ;;  %1957 = vst [vmem:[#allocation1 + $0x30] sm:$0xff] %v4069_v17  ;;  %v4136_v41 = vld [vmem:[%s5025_s0 + $0x190] sm:$0xff]   ;;  %v4053_v42 = vunpack.c.l.bf16 %v4179_v28  ;;  %v4054_v43 = vunpack.c.h.bf16 %v4179_v28  ;;  %v4057_v44 = vunpack.c.l.bf16 %v4180_v29  ;;  %v4058_v45 = vunpack.c.h.bf16 %v4180_v29  ;;  %v4137_v46 = vld [vmem:[%s5025_s0 + $0x188] sm:$0xff]  }
   0x9   :  { %1973 = vst [vmem:[#allocation1 + $0x28] sm:$0xff] %v4074_v20  ;;  %1989 = vst [vmem:[#allocation1 + $0x20] sm:$0xff] %v4073_v19  ;;  %v4138_v47 = vld [vmem:[%s5025_s0 + $0x180] sm:$0xff]   ;;  %v4061_v48 = vunpack.c.l.bf16 %v4181_v34  ;;  %v4062_v49 = vunpack.c.h.bf16 %v4181_v34  ;;  %v4065_v50 = vunpack.c.l.bf16 %v4182_v35  ;;  %v4066_v51 = vunpack.c.h.bf16 %v4182_v35  ;;  %v4151_v52 = vld [vmem:[%s5025_s0 + $0x118] sm:$0xff]  }
   0xa   :  { %2005 = vst [vmem:[#allocation1 + $0x18] sm:$0xff] %v4078_v25  ;;  %2021 = vst [vmem:[#allocation1 + $0x10] sm:$0xff] %v4077_v24  ;;  %v4152_v53 = vld [vmem:[%s5025_s0 + $0x110] sm:$0xff]   ;;  %v3877_v54 = vunpack.c.l.bf16 %v4135_v40  ;;  %v3878_v55 = vunpack.c.h.bf16 %v4135_v40  ;;  %v3881_v56 = vunpack.c.l.bf16 %v4136_v41  ;;  %v3882_v57 = vunpack.c.h.bf16 %v4136_v41  ;;  %v4153_v58 = vld [vmem:[%s5025_s0 + $0x108] sm:$0xff]  }
   0xb   :  { %2036 = vst [vmem:[#allocation1 + $0x8] sm:$0xff] %v4082_v27  ;;  %2049 = vst [vmem:[#allocation1] sm:$0xff] %v4081_v26  ;;  %v4154_v59 = vld [vmem:[%s5025_s0 + $0x100] sm:$0xff]   ;;  %v3885_v61 = vunpack.c.l.bf16 %v4137_v46  ;;  %v3886_v62 = vunpack.c.h.bf16 %v4137_v46  ;;  %v3889_v63 = vunpack.c.l.bf16 %v4138_v47  ;;  %v3890_v0 = vunpack.c.h.bf16 %v4138_v47  ;;  %v4131_v1 = vld [vmem:[%s5025_s0 + $0x1b8] sm:$0xff]  }
   0xc   :  { %1301 = vst [vmem:[#allocation1 + $0x178] sm:$0xff] %v3990_v31  ;;  %1317 = vst [vmem:[#allocation1 + $0x170] sm:$0xff] %v3989_v30  ;;  %v2204_v60 = vld [vmem:[#allocation1 + $0x107] ss:$8 sm:$0xf0]   ;;  %v3941_v4 = vunpack.c.l.bf16 %v4151_v52  ;;  %v3942_v5 = vunpack.c.h.bf16 %v4151_v52  ;;  %v3945_v6 = vunpack.c.l.bf16 %v4152_v53  ;;  %v3946_v7 = vunpack.c.h.bf16 %v4152_v53 }
   0xd   :  { %1333 = vst [vmem:[#allocation1 + $0x168] sm:$0xff] %v3994_v33  ;;  %1349 = vst [vmem:[#allocation1 + $0x160] sm:$0xff] %v3993_v32  ;;  %v4132_v2 = vld [vmem:[%s5025_s0 + $0x1b0] sm:$0xff]   ;;  %v4133_v8 = vld [vmem:[%s5025_s0 + $0x1a8] sm:$0xff]   ;;  %v3949_v11 = vunpack.c.l.bf16 %v4153_v58  ;;  %v3950_v12 = vunpack.c.h.bf16 %v4153_v58  ;;  %v3953_v13 = vunpack.c.l.bf16 %v4154_v59  ;;  %v3954_v17 = vunpack.c.h.bf16 %v4154_v59 }
   0xe   :  { %1365 = vst [vmem:[#allocation1 + $0x158] sm:$0xff] %v3998_v37  ;;  %1381 = vst [vmem:[#allocation1 + $0x150] sm:$0xff] %v3997_v36  ;;  %v2202_v3 = vld [vmem:[#allocation1 + $0x107] ss:$8 sm:$0xf]   ;;  %v3861_v18 = vunpack.c.l.bf16 %v4131_v1  ;;  %v3862_v19 = vunpack.c.h.bf16 %v4131_v1  ;;  %v3865_v20 = vunpack.c.l.bf16 %v4132_v2  ;;  %v3866_v24 = vunpack.c.h.bf16 %v4132_v2 }
   0xf   :  { %1397 = vst [vmem:[#allocation1 + $0x148] sm:$0xff] %v4002_v39  ;;  %1413 = vst [vmem:[#allocation1 + $0x140] sm:$0xff] %v4001_v38  ;;  %v2206_v10 = vsel %vm2052_vm0, %v2204_v60, %v2202_v3  ;;  %v4134_v14 = vld [vmem:[%s5025_s0 + $0x1a0] sm:$0xff]   ;;  %v4147_v15 = vld [vmem:[%s5025_s0 + $0x138] sm:$0xff]   ;;  %v3869_v25 = vunpack.c.l.bf16 %v4133_v8  ;;  %v3870_v26 = vunpack.c.h.bf16 %v4133_v8  ;;  %vm2724_vm5 = vcmask 654848  }
  0x10   :  { %1813 = vst [vmem:[#allocation1 + $0x78] sm:$0xff] %v4054_v43  ;;  %1829 = vst [vmem:[#allocation1 + $0x70] sm:$0xff] %v4053_v42  ;;  %v2194_v9 = vld [vmem:[#allocation1 + $0x7] ss:$8 sm:$0xf0]   ;;  %v3873_v31 = vunpack.c.l.bf16 %v4134_v14  ;;  %v3874_v32 = vunpack.c.h.bf16 %v4134_v14  ;;  %v3925_v33 = vunpack.c.l.bf16 %v4147_v15  ;;  %v3926_v38 = vunpack.c.h.bf16 %v4147_v15 }
  0x11   :  { %1845 = vst [vmem:[#allocation1 + $0x68] sm:$0xff] %v4058_v45  ;;  %1861 = vst [vmem:[#allocation1 + $0x60] sm:$0xff] %v4057_v44  ;;  %v4148_v21 = vld [vmem:[%s5025_s0 + $0x130] sm:$0xff]   ;;  %v4149_v27 = vld [vmem:[%s5025_s0 + $0x128] sm:$0xff]   ;;  %vm2899_vm6 = vcmask 523648   ;;  %vm3074_vm7 = vcmask 392448  }
  0x12   :  { %1877 = vst [vmem:[#allocation1 + $0x58] sm:$0xff] %v4062_v49  ;;  %1893 = vst [vmem:[#allocation1 + $0x50] sm:$0xff] %v4061_v48  ;;  %v2192_v16 = vld [vmem:[#allocation1 + $0x7] ss:$8 sm:$0xf]   ;;  %v3929_v39 = vunpack.c.l.bf16 %v4148_v21  ;;  %v3930_v40 = vunpack.c.h.bf16 %v4148_v21  ;;  %v3933_v43 = vunpack.c.l.bf16 %v4149_v27  ;;  %v3934_v44 = vunpack.c.h.bf16 %v4149_v27 }
  0x13   :  { %1909 = vst [vmem:[#allocation1 + $0x48] sm:$0xff] %v4066_v51  ;;  %1925 = vst [vmem:[#allocation1 + $0x40] sm:$0xff] %v4065_v50  ;;  %v2196_v22 = vsel %vm2052_vm0, %v2194_v9, %v2192_v16  ;;  %v4150_v28 = vld [vmem:[%s5025_s0 + $0x120] sm:$0xff]   ;;  %v4159_v34 = vld [vmem:[%s5025_s0 + $0xd8] sm:$0xff]   ;;  %vm3249_vm8 = vcmask 261248  }
  0x14   :  { %405 = vst [vmem:[#allocation1 + $0x338] sm:$0xff] %v3878_v55  ;;  %421 = vst [vmem:[#allocation1 + $0x330] sm:$0xff] %v3877_v54  ;;  %v2248_v23 = vld [vmem:[#allocation1 + $0x147] ss:$8 sm:$0xf0]   ;;  %v4200_v29 = vpack.i.bf16 %v2206_v10, %v2196_v22  ;;  %v3937_v45 = vunpack.c.l.bf16 %v4150_v28  ;;  %v3938_v46 = vunpack.c.h.bf16 %v4150_v28  ;;  %v3973_v51 = vunpack.c.l.bf16 %v4159_v34 }
  0x15   :  { %437 = vst [vmem:[#allocation1 + $0x328] sm:$0xff] %v3882_v57  ;;  %453 = vst [vmem:[#allocation1 + $0x320] sm:$0xff] %v3881_v56  ;;  %v4160_v35 = vld [vmem:[%s5025_s0 + $0xd0] sm:$0xff]   ;;  %v4161_v41 = vld [vmem:[%s5025_s0 + $0xc8] sm:$0xff]   ;;  %v3974_v52 = vunpack.c.h.bf16 %v4159_v34 }
  0x16   :  { %469 = vst [vmem:[#allocation1 + $0x318] sm:$0xff] %v3886_v62  ;;  %485 = vst [vmem:[#allocation1 + $0x310] sm:$0xff] %v3885_v61  ;;  %v2246_v30 = vld [vmem:[#allocation1 + $0x147] ss:$8 sm:$0xf]   ;;  %4201 = vrot.lane.b32.xlu0 %v4200_v29, %s4480_s18  ;;  %v3977_v53 = vunpack.c.l.bf16 %v4160_v35  ;;  %v3978_v58 = vunpack.c.h.bf16 %v4160_v35  ;;  %v3981_v59 = vunpack.c.l.bf16 %v4161_v41  ;;  %v3982_v60 = vunpack.c.h.bf16 %v4161_v41 }
  0x17   :  { %501 = vst [vmem:[#allocation1 + $0x308] sm:$0xff] %v3890_v0  ;;  %517 = vst [vmem:[#allocation1 + $0x300] sm:$0xff] %v3889_v63  ;;  %v2250_v37 = vsel %vm2052_vm0, %v2248_v23, %v2246_v30  ;;  %v4162_v47 = vld [vmem:[%s5025_s0 + $0xc0] sm:$0xff]   ;;  %v4175_v48 = vld [vmem:[%s5025_s0 + $0x58] sm:$0xff]  }
  0x18   :  { %917 = vst [vmem:[#allocation1 + $0x238] sm:$0xff] %v3942_v5  ;;  %933 = vst [vmem:[#allocation1 + $0x230] sm:$0xff] %v3941_v4  ;;  %v2237_v36 = vld [vmem:[#allocation1 + $0x47] ss:$8 sm:$0xf0]   ;;  %v3985_v1 = vunpack.c.l.bf16 %v4162_v47  ;;  %v3986_v2 = vunpack.c.h.bf16 %v4162_v47  ;;  %v4037_v3 = vunpack.c.l.bf16 %v4175_v48  ;;  %v4038_v5 = vunpack.c.h.bf16 %v4175_v48 }
  0x19   :  { %949 = vst [vmem:[#allocation1 + $0x228] sm:$0xff] %v3946_v7  ;;  %965 = vst [vmem:[#allocation1 + $0x220] sm:$0xff] %v3945_v6  ;;  %v4176_v54 = vld [vmem:[%s5025_s0 + $0x50] sm:$0xff]   ;;  %v4177_v55 = vld [vmem:[%s5025_s0 + $0x48] sm:$0xff]  }
  0x1a   :  { %981 = vst [vmem:[#allocation1 + $0x218] sm:$0xff] %v3950_v12  ;;  %997 = vst [vmem:[#allocation1 + $0x210] sm:$0xff] %v3949_v11  ;;  %v2235_v42 = vld [vmem:[#allocation1 + $0x47] ss:$8 sm:$0xf]   ;;  %v4041_v6 = vunpack.c.l.bf16 %v4176_v54  ;;  %v4042_v7 = vunpack.c.h.bf16 %v4176_v54  ;;  %v4045_v8 = vunpack.c.l.bf16 %v4177_v55  ;;  %v4046_v12 = vunpack.c.h.bf16 %v4177_v55 }
  0x1b   :  { %1029 = vst [vmem:[#allocation1 + $0x200] sm:$0xff] %v3953_v13  ;;  %1013 = vst [vmem:[#allocation1 + $0x208] sm:$0xff] %v3954_v17  ;;  %v2239_v49 = vsel %vm2052_vm0, %v2237_v36, %v2235_v42  ;;  %v4178_v61 = vld [vmem:[%s5025_s0 + $0x40] sm:$0xff]   ;;  %v4127_v62 = vld [vmem:[%s5025_s0 + $0x1d8] sm:$0xff]  }
  0x1c   :  { %277 = vst [vmem:[#allocation1 + $0x378] sm:$0xff] %v3862_v19  ;;  %293 = vst [vmem:[#allocation1 + $0x370] sm:$0xff] %v3861_v18  ;;  %v2226_v50 = vld [vmem:[#allocation1 + $0x307] ss:$8 sm:$0xf0]   ;;  %v4210_v56 = vpack.i.bf16 %v2250_v37, %v2239_v49  ;;  %v4049_v13 = vunpack.c.l.bf16 %v4178_v61  ;;  %v4050_v14 = vunpack.c.h.bf16 %v4178_v61  ;;  %v3845_v15 = vunpack.c.l.bf16 %v4127_v62 }
  0x1d   :  { %325 = vst [vmem:[#allocation1 + $0x360] sm:$0xff] %v3865_v20  ;;  %309 = vst [vmem:[#allocation1 + $0x368] sm:$0xff] %v3866_v24  ;;  %v4128_v4 = vld [vmem:[%s5025_s0 + $0x1d0] sm:$0xff]   ;;  %v4129_v9 = vld [vmem:[%s5025_s0 + $0x1c8] sm:$0xff]   ;;  %v3846_v19 = vunpack.c.h.bf16 %v4127_v62 }
  0x1e   :  { %341 = vst [vmem:[#allocation1 + $0x358] sm:$0xff] %v3870_v26  ;;  %357 = vst [vmem:[#allocation1 + $0x350] sm:$0xff] %v3869_v25  ;;  %v2224_v57 = vld [vmem:[#allocation1 + $0x307] ss:$8 sm:$0xf]   ;;  %4211 = vrot.lane.b32.xlu1 %v4210_v56, %s4480_s18  ;;  %v3849_v20 = vunpack.c.l.bf16 %v4128_v4  ;;  %v3850_v21 = vunpack.c.h.bf16 %v4128_v4  ;;  %v3853_v26 = vunpack.c.l.bf16 %v4129_v9  ;;  %v3854_v27 = vunpack.c.h.bf16 %v4129_v9 }
  0x1f   :  { %373 = vst [vmem:[#allocation1 + $0x348] sm:$0xff] %v3874_v32  ;;  %389 = vst [vmem:[#allocation1 + $0x340] sm:$0xff] %v3873_v31  ;;  %v2228_v0 = vsel %vm2052_vm0, %v2226_v50, %v2224_v57  ;;  %v4130_v10 = vld [vmem:[%s5025_s0 + $0x1c0] sm:$0xff]   ;;  %v4143_v16 = vld [vmem:[%s5025_s0 + $0x158] sm:$0xff]  }
  0x20   :  { %805 = vst [vmem:[#allocation1 + $0x270] sm:$0xff] %v3925_v33  ;;  %789 = vst [vmem:[#allocation1 + $0x278] sm:$0xff] %v3926_v38  ;;  %v2215_v63 = vld [vmem:[#allocation1 + $0x207] ss:$8 sm:$0xf0]   ;;  %v3857_v28 = vunpack.c.l.bf16 %v4130_v10  ;;  %v3858_v33 = vunpack.c.h.bf16 %v4130_v10  ;;  %v3909_v34 = vunpack.c.l.bf16 %v4143_v16  ;;  %v3910_v35 = vunpack.c.h.bf16 %v4143_v16 }
  0x21   :  { %821 = vst [vmem:[#allocation1 + $0x268] sm:$0xff] %v3930_v40  ;;  %837 = vst [vmem:[#allocation1 + $0x260] sm:$0xff] %v3929_v39  ;;  %v4144_v22 = vld [vmem:[%s5025_s0 + $0x150] sm:$0xff]   ;;  %v4145_v23 = vld [vmem:[%s5025_s0 + $0x148] sm:$0xff]  }
  0x22   :  { %853 = vst [vmem:[#allocation1 + $0x258] sm:$0xff] %v3934_v44  ;;  %869 = vst [vmem:[#allocation1 + $0x250] sm:$0xff] %v3933_v43  ;;  %v2213_v11 = vld [vmem:[#allocation1 + $0x207] ss:$8 sm:$0xf]   ;;  %v3913_v38 = vunpack.c.l.bf16 %v4144_v22  ;;  %v3914_v39 = vunpack.c.h.bf16 %v4144_v22  ;;  %v3917_v40 = vunpack.c.l.bf16 %v4145_v23  ;;  %v3918_v41 = vunpack.c.h.bf16 %v4145_v23 }
  0x23   :  { %885 = vst [vmem:[#allocation1 + $0x248] sm:$0xff] %v3938_v46  ;;  %901 = vst [vmem:[#allocation1 + $0x240] sm:$0xff] %v3937_v45  ;;  %v2217_v17 = vsel %vm2052_vm0, %v2215_v63, %v2213_v11  ;;  %v4146_v29 = vld [vmem:[%s5025_s0 + $0x140] sm:$0xff]   ;;  %v4155_v30 = vld [vmem:[%s5025_s0 + $0xf8] sm:$0xff]  }
  0x24   :  { %1173 = vst [vmem:[#allocation1 + $0x1b8] sm:$0xff] %v3974_v52  ;;  %1189 = vst [vmem:[#allocation1 + $0x1b0] sm:$0xff] %v3973_v51  ;;  %v2270_v18 = vld [vmem:[#allocation1 + $0x347] ss:$8 sm:$0xf0]   ;;  %v4205_v24 = vpack.i.bf16 %v2228_v0, %v2217_v17  ;;  %v3921_v45 = vunpack.c.l.bf16 %v4146_v29  ;;  %v3922_v46 = vunpack.c.h.bf16 %v4146_v29  ;;  %v3957_v47 = vunpack.c.l.bf16 %v4155_v30 }
  0x25   :  { %1221 = vst [vmem:[#allocation1 + $0x1a0] sm:$0xff] %v3977_v53  ;;  %1205 = vst [vmem:[#allocation1 + $0x1a8] sm:$0xff] %v3978_v58  ;;  %v4156_v36 = vld [vmem:[%s5025_s0 + $0xf0] sm:$0xff]   ;;  %v4157_v42 = vld [vmem:[%s5025_s0 + $0xe8] sm:$0xff]   ;;  %v3958_v52 = vunpack.c.h.bf16 %v4155_v30 }
  0x26   :  { %1237 = vst [vmem:[#allocation1 + $0x198] sm:$0xff] %v3982_v60  ;;  %1253 = vst [vmem:[#allocation1 + $0x190] sm:$0xff] %v3981_v59  ;;  %v2268_v25 = vld [vmem:[#allocation1 + $0x347] ss:$8 sm:$0xf]   ;;  %4206 = vrot.lane.b32.xlu0 %v4205_v24, %s4480_s18  ;;  %v3961_v53 = vunpack.c.l.bf16 %v4156_v36  ;;  %v3962_v54 = vunpack.c.h.bf16 %v4156_v36  ;;  %v3965_v58 = vunpack.c.l.bf16 %v4157_v42  ;;  %v3966_v59 = vunpack.c.h.bf16 %v4157_v42 }
  0x27   :  { %1269 = vst [vmem:[#allocation1 + $0x188] sm:$0xff] %v3986_v2  ;;  %1285 = vst [vmem:[#allocation1 + $0x180] sm:$0xff] %v3985_v1  ;;  %v2272_v32 = vsel %vm2052_vm0, %v2270_v18, %v2268_v25  ;;  %v4158_v43 = vld [vmem:[%s5025_s0 + $0xe0] sm:$0xff]   ;;  %v4171_v48 = vld [vmem:[%s5025_s0 + $0x78] sm:$0xff]  }
  0x28   :  { %1701 = vst [vmem:[#allocation1 + $0xb0] sm:$0xff] %v4037_v3  ;;  %1685 = vst [vmem:[#allocation1 + $0xb8] sm:$0xff] %v4038_v5  ;;  %v2259_v31 = vld [vmem:[#allocation1 + $0x247] ss:$8 sm:$0xf0]   ;;  %v3969_v60 = vunpack.c.l.bf16 %v4158_v43  ;;  %v3970_v61 = vunpack.c.h.bf16 %v4158_v43  ;;  %v4021_v1 = vunpack.c.l.bf16 %v4171_v48  ;;  %v4022_v2 = vunpack.c.h.bf16 %v4171_v48 }
  0x29   :  { %1717 = vst [vmem:[#allocation1 + $0xa8] sm:$0xff] %v4042_v7  ;;  %1733 = vst [vmem:[#allocation1 + $0xa0] sm:$0xff] %v4041_v6  ;;  %v4172_v49 = vld [vmem:[%s5025_s0 + $0x70] sm:$0xff]   ;;  %v4173_v55 = vld [vmem:[%s5025_s0 + $0x68] sm:$0xff]  }
  0x2a   :  { %1765 = vst [vmem:[#allocation1 + $0x90] sm:$0xff] %v4045_v8  ;;  %1749 = vst [vmem:[#allocation1 + $0x98] sm:$0xff] %v4046_v12  ;;  %v2257_v37 = vld [vmem:[#allocation1 + $0x247] ss:$8 sm:$0xf]   ;;  %v4025_v3 = vunpack.c.l.bf16 %v4172_v49  ;;  %v4026_v7 = vunpack.c.h.bf16 %v4172_v49  ;;  %v4029_v8 = vunpack.c.l.bf16 %v4173_v55  ;;  %v4030_v9 = vunpack.c.h.bf16 %v4173_v55 }
  0x2b   :  { %1781 = vst [vmem:[#allocation1 + $0x88] sm:$0xff] %v4050_v14  ;;  %1797 = vst [vmem:[#allocation1 + $0x80] sm:$0xff] %v4049_v13  ;;  %v2261_v44 = vsel %vm2052_vm0, %v2259_v31, %v2257_v37  ;;  %v4174_v56 = vld [vmem:[%s5025_s0 + $0x60] sm:$0xff]   ;;  %v4123_v62 = vld [vmem:[%s5025_s0 + $0x1f8] sm:$0xff]  }
  0x2c   :  { %165 = vst [vmem:[#allocation1 + $0x3b0] sm:$0xff] %v3845_v15  ;;  %149 = vst [vmem:[#allocation1 + $0x3b8] sm:$0xff] %v3846_v19  ;;  %v4215_v50 = vpack.i.bf16 %v2272_v32, %v2261_v44  ;;  %v2292_v51 = vld [vmem:[#allocation1 + $0x187] ss:$8 sm:$0xf0]   ;;  %v4033_v10 = vunpack.c.l.bf16 %v4174_v56  ;;  %v4034_v15 = vunpack.c.h.bf16 %v4174_v56  ;;  %v3829_v16 = vunpack.c.l.bf16 %v4123_v62 }
  0x2d   :  { %181 = vst [vmem:[#allocation1 + $0x3a8] sm:$0xff] %v3850_v21  ;;  %197 = vst [vmem:[#allocation1 + $0x3a0] sm:$0xff] %v3849_v20  ;;  %v4124_v4 = vld [vmem:[%s5025_s0 + $0x1f0] sm:$0xff]   ;;  %v4125_v5 = vld [vmem:[%s5025_s0 + $0x1e8] sm:$0xff]   ;;  %v3830_v17 = vunpack.c.h.bf16 %v4123_v62 }
  0x2e   :  { %213 = vst [vmem:[#allocation1 + $0x398] sm:$0xff] %v3854_v27  ;;  %229 = vst [vmem:[#allocation1 + $0x390] sm:$0xff] %v3853_v26  ;;  %v2290_v57 = vld [vmem:[#allocation1 + $0x187] ss:$8 sm:$0xf]   ;;  %4216 = vrot.lane.b32.xlu1 %v4215_v50, %s4480_s18  ;;  %v3833_v20 = vunpack.c.l.bf16 %v4124_v4  ;;  %v3834_v21 = vunpack.c.h.bf16 %v4124_v4  ;;  %v3837_v22 = vunpack.c.l.bf16 %v4125_v5  ;;  %v3838_v26 = vunpack.c.h.bf16 %v4125_v5 }
  0x2f   :  { %261 = vst [vmem:[#allocation1 + $0x380] sm:$0xff] %v3857_v28  ;;  %245 = vst [vmem:[#allocation1 + $0x388] sm:$0xff] %v3858_v33  ;;  %v2294_v0 = vsel %vm2052_vm0, %v2292_v51, %v2290_v57  ;;  %v4126_v11 = vld [vmem:[%s5025_s0 + $0x1e0] sm:$0xff]   ;;  %v4139_v12 = vld [vmem:[%s5025_s0 + $0x178] sm:$0xff]  }
  0x30   :  { %661 = vst [vmem:[#allocation1 + $0x2b8] sm:$0xff] %v3910_v35  ;;  %677 = vst [vmem:[#allocation1 + $0x2b0] sm:$0xff] %v3909_v34  ;;  %v2281_v63 = vld [vmem:[#allocation1 + $0x87] ss:$8 sm:$0xf0]   ;;  %v3841_v27 = vunpack.c.l.bf16 %v4126_v11  ;;  %v3842_v28 = vunpack.c.h.bf16 %v4126_v11  ;;  %v3893_v29 = vunpack.c.l.bf16 %v4139_v12  ;;  %v3894_v32 = vunpack.c.h.bf16 %v4139_v12 }
  0x31   :  { %693 = vst [vmem:[#allocation1 + $0x2a8] sm:$0xff] %v3914_v39  ;;  %709 = vst [vmem:[#allocation1 + $0x2a0] sm:$0xff] %v3913_v38  ;;  %v4140_v18 = vld [vmem:[%s5025_s0 + $0x170] sm:$0xff]   ;;  %v4141_v23 = vld [vmem:[%s5025_s0 + $0x168] sm:$0xff]  }
  0x32   :  { %725 = vst [vmem:[#allocation1 + $0x298] sm:$0xff] %v3918_v41  ;;  %741 = vst [vmem:[#allocation1 + $0x290] sm:$0xff] %v3917_v40  ;;  %v2279_v6 = vld [vmem:[#allocation1 + $0x87] ss:$8 sm:$0xf]   ;;  %v3897_v33 = vunpack.c.l.bf16 %v4140_v18  ;;  %v3898_v34 = vunpack.c.h.bf16 %v4140_v18  ;;  %v3901_v36 = vunpack.c.l.bf16 %v4141_v23  ;;  %v3902_v37 = vunpack.c.h.bf16 %v4141_v23 }
  0x33   :  { %757 = vst [vmem:[#allocation1 + $0x288] sm:$0xff] %v3922_v46  ;;  %773 = vst [vmem:[#allocation1 + $0x280] sm:$0xff] %v3921_v45  ;;  %v2283_v13 = vsel %vm2052_vm0, %v2281_v63, %v2279_v6  ;;  %v4142_v24 = vld [vmem:[%s5025_s0 + $0x160] sm:$0xff]   ;;  %s4481_s0 = smov 96  }
  0x34   :  { %1061 = vst [vmem:[#allocation1 + $0x1f0] sm:$0xff] %v3957_v47  ;;  %1045 = vst [vmem:[#allocation1 + $0x1f8] sm:$0xff] %v3958_v52  ;;  %v2314_v14 = vld [vmem:[#allocation1 + $0x387] ss:$8 sm:$0xf0]   ;;  %v4220_v19 = vpack.i.bf16 %v2294_v0, %v2283_v13  ;;  %v3905_v38 = vunpack.c.l.bf16 %v4142_v24  ;;  %v3906_v39 = vunpack.c.h.bf16 %v4142_v24 }
  0x35   :  { %1077 = vst [vmem:[#allocation1 + $0x1e8] sm:$0xff] %v3962_v54  ;;  %1093 = vst [vmem:[#allocation1 + $0x1e0] sm:$0xff] %v3961_v53  ;;  %v2367_v42 = vld [vmem:[#allocation1 + $0x6] ss:$8 sm:$0xf]  }
  0x36   :  { %1109 = vst [vmem:[#allocation1 + $0x1d8] sm:$0xff] %v3966_v59  ;;  %1125 = vst [vmem:[#allocation1 + $0x1d0] sm:$0xff] %v3965_v58  ;;  %v2312_v25 = vld [vmem:[#allocation1 + $0x387] ss:$8 sm:$0xf]   ;;  %4221 = vrot.lane.b32.xlu0 %v4220_v19, %s4480_s18 }
  0x37   :  { %1141 = vst [vmem:[#allocation1 + $0x1c8] sm:$0xff] %v3970_v61  ;;  %1157 = vst [vmem:[#allocation1 + $0x1c0] sm:$0xff] %v3969_v60  ;;  %v2316_v31 = vsel %vm2052_vm0, %v2314_v14, %v2312_v25  ;;  %v2369_v45 = vld [vmem:[#allocation1 + $0x6] ss:$8 sm:$0xf0]  }
  0x38   :  { %1557 = vst [vmem:[#allocation1 + $0xf8] sm:$0xff] %v4022_v2  ;;  %1573 = vst [vmem:[#allocation1 + $0xf0] sm:$0xff] %v4021_v1  ;;  %v2303_v30 = vld [vmem:[#allocation1 + $0x287] ss:$8 sm:$0xf0]   ;;  %v2371_v59 = vsel %vm2052_vm0, %v2369_v45, %v2367_v42 }
  0x39   :  { %1605 = vst [vmem:[#allocation1 + $0xe0] sm:$0xff] %v4025_v3  ;;  %1589 = vst [vmem:[#allocation1 + $0xe8] sm:$0xff] %v4026_v7  ;;  %v2377_v46 = vld [vmem:[#allocation1 + $0x106] ss:$8 sm:$0xf]  }
  0x3a   :  { %1621 = vst [vmem:[#allocation1 + $0xd8] sm:$0xff] %v4030_v9  ;;  %1637 = vst [vmem:[#allocation1 + $0xd0] sm:$0xff] %v4029_v8  ;;  %v2301_v35 = vld [vmem:[#allocation1 + $0x287] ss:$8 sm:$0xf]  }
  0x3b   :  { %1669 = vst [vmem:[#allocation1 + $0xc0] sm:$0xff] %v4033_v10  ;;  %1653 = vst [vmem:[#allocation1 + $0xc8] sm:$0xff] %v4034_v15  ;;  %v2305_v40 = vsel %vm2052_vm0, %v2303_v30, %v2301_v35  ;;  %v2379_v47 = vld [vmem:[#allocation1 + $0x106] ss:$8 sm:$0xf0]  }
  0x3c   :  { %21 = vst [vmem:[#allocation1 + $0x3f8] sm:$0xff] %v3830_v17  ;;  %37 = vst [vmem:[#allocation1 + $0x3f0] sm:$0xff] %v3829_v16  ;;  %v2336_v41 = vld [vmem:[#allocation1 + $0x1c7] ss:$8 sm:$0xf0]   ;;  %v4225_v43 = vpack.i.bf16 %v2316_v31, %v2305_v40  ;;  %v2381_v60 = vsel %vm2052_vm0, %v2379_v47, %v2377_v46 }
  0x3d   :  { %53 = vst [vmem:[#allocation1 + $0x3e8] sm:$0xff] %v3834_v21  ;;  %69 = vst [vmem:[#allocation1 + $0x3e0] sm:$0xff] %v3833_v20  ;;  %v2388_v50 = vld [vmem:[#allocation1 + $0x206] ss:$8 sm:$0xf]   ;;  %v4240_v7 = vpack.i.bf16 %v2381_v60, %v2371_v59 }
  0x3e   :  { %101 = vst [vmem:[#allocation1 + $0x3d0] sm:$0xff] %v3837_v22  ;;  %85 = vst [vmem:[#allocation1 + $0x3d8] sm:$0xff] %v3838_v26  ;;  %v2334_v44 = vld [vmem:[#allocation1 + $0x1c7] ss:$8 sm:$0xf]   ;;  %4226 = vrot.lane.b32.xlu1 %v4225_v43, %s4480_s18 }
  0x3f   :  { %117 = vst [vmem:[#allocation1 + $0x3c8] sm:$0xff] %v3842_v28  ;;  %133 = vst [vmem:[#allocation1 + $0x3c0] sm:$0xff] %v3841_v27  ;;  %v2338_v49 = vsel %vm2052_vm0, %v2336_v41, %v2334_v44  ;;  %v2390_v51 = vld [vmem:[#allocation1 + $0x206] ss:$8 sm:$0xf0]  }
  0x40   :  { %549 = vst [vmem:[#allocation1 + $0x2f0] sm:$0xff] %v3893_v29  ;;  %533 = vst [vmem:[#allocation1 + $0x2f8] sm:$0xff] %v3894_v32  ;;  %v2325_v48 = vld [vmem:[#allocation1 + $0xc7] ss:$8 sm:$0xf0]   ;;  %v2392_v8 = vsel %vm2052_vm0, %v2390_v51, %v2388_v50 }
  0x41   :  { %565 = vst [vmem:[#allocation1 + $0x2e8] sm:$0xff] %v3898_v34  ;;  %581 = vst [vmem:[#allocation1 + $0x2e0] sm:$0xff] %v3897_v33  ;;  %v2399_v52 = vld [vmem:[#allocation1 + $0x306] ss:$8 sm:$0xf]  }
  0x42   :  { %597 = vst [vmem:[#allocation1 + $0x2d8] sm:$0xff] %v3902_v37  ;;  %613 = vst [vmem:[#allocation1 + $0x2d0] sm:$0xff] %v3901_v36  ;;  %v2401_v53 = vld [vmem:[#allocation1 + $0x306] ss:$8 sm:$0xf0]  }
  0x43   :  { %629 = vst [vmem:[#allocation1 + $0x2c8] sm:$0xff] %v3906_v39  ;;  %645 = vst [vmem:[#allocation1 + $0x2c0] sm:$0xff] %v3905_v38  ;;  %v2323_v54 = vld [vmem:[#allocation1 + $0xc7] ss:$8 sm:$0xf]   ;;  %v2403_v9 = vsel %vm2052_vm0, %v2401_v53, %v2399_v52 }
  0x44   :  { %v2410_v55 = vld [vmem:[#allocation1 + $0x46] ss:$8 sm:$0xf]   ;;  %v2327_v57 = vsel %vm2052_vm0, %v2325_v48, %v2323_v54  ;;  %v2358_v58 = vld [vmem:[#allocation1 + $0x3c7] ss:$8 sm:$0xf0]   ;;  %v4245_v19 = vpack.i.bf16 %v2403_v9, %v2392_v8 }
  0x45   :  { %v2412_v56 = vld [vmem:[#allocation1 + $0x46] ss:$8 sm:$0xf0]   ;;  %v4230_v62 = vpack.i.bf16 %v2338_v49, %v2327_v57  ;;  %v2542_v43 = vld [vmem:[#allocation1 + $0x5] ss:$8 sm:$0xf]  }
  0x46   :  { %v2421_v61 = vld [vmem:[#allocation1 + $0x146] ss:$8 sm:$0xf]   ;;  %v2356_v63 = vld [vmem:[#allocation1 + $0x3c7] ss:$8 sm:$0xf]   ;;  %v2414_v12 = vsel %vm2052_vm0, %v2412_v56, %v2410_v55 }
  0x47   :  { %v2423_v0 = vld [vmem:[#allocation1 + $0x146] ss:$8 sm:$0xf0]   ;;  %v2360_v2 = vsel %vm2052_vm0, %v2358_v58, %v2356_v63  ;;  %4231 = vrot.lane.b32.xlu0 %v4230_v62, %s4480_s18  ;;  %v2544_v44 = vld [vmem:[#allocation1 + $0x5] ss:$8 sm:$0xf0]  }
  0x48   :  { %v2347_v1 = vld [vmem:[#allocation1 + $0x2c7] ss:$8 sm:$0xf0]   ;;  %v2432_v3 = vld [vmem:[#allocation1 + $0x246] ss:$8 sm:$0xf]   ;;  %v2425_v13 = vsel %vm2052_vm0, %v2423_v0, %v2421_v61  ;;  %v2546_v55 = vsel %vm2052_vm0, %v2544_v44, %v2542_v43 }
  0x49   :  { %v2434_v4 = vld [vmem:[#allocation1 + $0x246] ss:$8 sm:$0xf0]   ;;  %v4250_v22 = vpack.i.bf16 %v2425_v13, %v2414_v12  ;;  %v2552_v45 = vld [vmem:[#allocation1 + $0x105] ss:$8 sm:$0xf]  }
  0x4a   :  { %v2443_v5 = vld [vmem:[#allocation1 + $0x346] ss:$8 sm:$0xf]   ;;  %v2345_v6 = vld [vmem:[#allocation1 + $0x2c7] ss:$8 sm:$0xf]   ;;  %v2436_v23 = vsel %vm2052_vm0, %v2434_v4, %v2432_v3 }
  0x4b   :  { %v2445_v10 = vld [vmem:[#allocation1 + $0x346] ss:$8 sm:$0xf0]   ;;  %v2349_v11 = vsel %vm2052_vm0, %v2347_v1, %v2345_v6  ;;  %4241 = vrot.lane.b32.xlu0 %v4240_v7, %s4481_s0  ;;  %v2554_v46 = vld [vmem:[#allocation1 + $0x105] ss:$8 sm:$0xf0]  }
  0x4c   :  { %v2454_v14 = vld [vmem:[#allocation1 + $0x86] ss:$8 sm:$0xf]   ;;  %v4235_v16 = vpack.i.bf16 %v2360_v2, %v2349_v11  ;;  %v2447_v24 = vsel %vm2052_vm0, %v2445_v10, %v2443_v5  ;;  %v2563_v48 = vld [vmem:[#allocation1 + $0x205] ss:$8 sm:$0xf]   ;;  %v2556_v56 = vsel %vm2052_vm0, %v2554_v46, %v2552_v45 }
  0x4d   :  { %v2456_v15 = vld [vmem:[#allocation1 + $0x86] ss:$8 sm:$0xf0]   ;;  %v4255_v33 = vpack.i.bf16 %v2447_v24, %v2436_v23  ;;  %v2565_v49 = vld [vmem:[#allocation1 + $0x205] ss:$8 sm:$0xf0]   ;;  %v4280_v0 = vpack.i.bf16 %v2556_v56, %v2546_v55 }
  0x4e   :  { %v2465_v17 = vld [vmem:[#allocation1 + $0x186] ss:$8 sm:$0xf]   ;;  %4236 = vrot.lane.b32.xlu1 %v4235_v16, %s4480_s18  ;;  %v2458_v27 = vsel %vm2052_vm0, %v2456_v15, %v2454_v14  ;;  %v2574_v53 = vld [vmem:[#allocation1 + $0x305] ss:$8 sm:$0xf]   ;;  %v2567_v1 = vsel %vm2052_vm0, %v2565_v49, %v2563_v48 }
  0x4f   :  { %v2467_v18 = vld [vmem:[#allocation1 + $0x186] ss:$8 sm:$0xf0]   ;;  %4251 = vrot.lane.b32.xlu0 %v4250_v22, %s4481_s0  ;;  %v2576_v54 = vld [vmem:[#allocation1 + $0x305] ss:$8 sm:$0xf0]  }
  0x50   :  { %v2476_v20 = vld [vmem:[#allocation1 + $0x286] ss:$8 sm:$0xf]   ;;  %v2469_v28 = vsel %vm2052_vm0, %v2467_v18, %v2465_v17  ;;  %v2585_v57 = vld [vmem:[#allocation1 + $0x45] ss:$8 sm:$0xf]   ;;  %v2578_v2 = vsel %vm2052_vm0, %v2576_v54, %v2574_v53 }
  0x51   :  { %v2478_v21 = vld [vmem:[#allocation1 + $0x286] ss:$8 sm:$0xf0]   ;;  %v4260_v36 = vpack.i.bf16 %v2469_v28, %v2458_v27  ;;  %v2587_v58 = vld [vmem:[#allocation1 + $0x45] ss:$8 sm:$0xf0]   ;;  %v4285_v11 = vpack.i.bf16 %v2578_v2, %v2567_v1 }
  0x52   :  { %v2487_v25 = vld [vmem:[#allocation1 + $0x386] ss:$8 sm:$0xf]   ;;  %4246 = vrot.lane.b32.xlu1 %v4245_v19, %s4481_s0  ;;  %v2480_v37 = vsel %vm2052_vm0, %v2478_v21, %v2476_v20  ;;  %v2596_v59 = vld [vmem:[#allocation1 + $0x145] ss:$8 sm:$0xf]   ;;  %v2589_v5 = vsel %vm2052_vm0, %v2587_v58, %v2585_v57 }
  0x53   :  { %v2489_v26 = vld [vmem:[#allocation1 + $0x386] ss:$8 sm:$0xf0]   ;;  %4261 = vrot.lane.b32.xlu0 %v4260_v36, %s4481_s0  ;;  %v2598_v60 = vld [vmem:[#allocation1 + $0x145] ss:$8 sm:$0xf0]  }
  0x54   :  { %v2498_v29 = vld [vmem:[#allocation1 + $0xc6] ss:$8 sm:$0xf]   ;;  %v2491_v38 = vsel %vm2052_vm0, %v2489_v26, %v2487_v25  ;;  %v2607_v62 = vld [vmem:[#allocation1 + $0x245] ss:$8 sm:$0xf]   ;;  %v2600_v6 = vsel %vm2052_vm0, %v2598_v60, %v2596_v59 }
  0x55   :  { %v2500_v30 = vld [vmem:[#allocation1 + $0xc6] ss:$8 sm:$0xf0]   ;;  %v4265_v47 = vpack.i.bf16 %v2491_v38, %v2480_v37  ;;  %v2609_v63 = vld [vmem:[#allocation1 + $0x245] ss:$8 sm:$0xf0]   ;;  %v4290_v14 = vpack.i.bf16 %v2600_v6, %v2589_v5 }
  0x56   :  { %v2509_v31 = vld [vmem:[#allocation1 + $0x1c6] ss:$8 sm:$0xf]   ;;  %v2502_v41 = vsel %vm2052_vm0, %v2500_v30, %v2498_v29  ;;  %4256 = vrot.lane.b32.xlu1 %v4255_v33, %s4481_s0  ;;  %v2618_v3 = vld [vmem:[#allocation1 + $0x345] ss:$8 sm:$0xf]   ;;  %v2611_v15 = vsel %vm2052_vm0, %v2609_v63, %v2607_v62 }
  0x57   :  { %v2511_v32 = vld [vmem:[#allocation1 + $0x1c6] ss:$8 sm:$0xf0]   ;;  %v2620_v4 = vld [vmem:[#allocation1 + $0x345] ss:$8 sm:$0xf0]  }
  0x58   :  { %v2520_v34 = vld [vmem:[#allocation1 + $0x2c6] ss:$8 sm:$0xf]   ;;  %v2513_v42 = vsel %vm2052_vm0, %v2511_v32, %v2509_v31  ;;  %v2629_v7 = vld [vmem:[#allocation1 + $0x85] ss:$8 sm:$0xf]   ;;  %v2622_v16 = vsel %vm2052_vm0, %v2620_v4, %v2618_v3 }
  0x59   :  { %v2522_v35 = vld [vmem:[#allocation1 + $0x2c6] ss:$8 sm:$0xf0]   ;;  %v4270_v50 = vpack.i.bf16 %v2513_v42, %v2502_v41  ;;  %v2631_v8 = vld [vmem:[#allocation1 + $0x85] ss:$8 sm:$0xf0]   ;;  %v4295_v25 = vpack.i.bf16 %v2622_v16, %v2611_v15 }
  0x5a   :  { %v2531_v39 = vld [vmem:[#allocation1 + $0x3c6] ss:$8 sm:$0xf]   ;;  %v2524_v51 = vsel %vm2052_vm0, %v2522_v35, %v2520_v34  ;;  %4266 = vrot.lane.b32.xlu1 %v4265_v47, %s4481_s0  ;;  %v2640_v9 = vld [vmem:[#allocation1 + $0x185] ss:$8 sm:$0xf]   ;;  %v2633_v19 = vsel %vm2052_vm0, %v2631_v8, %v2629_v7 }
  0x5b   :  { %v2533_v40 = vld [vmem:[#allocation1 + $0x3c6] ss:$8 sm:$0xf0]   ;;  %4271 = vrot.lane.b32.xlu0 %v4270_v50, %s4481_s0  ;;  %v2642_v10 = vld [vmem:[#allocation1 + $0x185] ss:$8 sm:$0xf0]  }
  0x5c   :  { %v2535_v52 = vsel %vm2052_vm0, %v2533_v40, %v2531_v39  ;;  %v2651_v12 = vld [vmem:[#allocation1 + $0x285] ss:$8 sm:$0xf]   ;;  %s4482_s18 = smov 80   ;;  %v2644_v20 = vsel %vm2052_vm0, %v2642_v10, %v2640_v9 }
  0x5d   :  { %v4275_v61 = vpack.i.bf16 %v2535_v52, %v2524_v51  ;;  %v2653_v13 = vld [vmem:[#allocation1 + $0x285] ss:$8 sm:$0xf0]   ;;  %v4300_v28 = vpack.i.bf16 %v2644_v20, %v2633_v19  ;;  %v2717_v35 = vld [vmem:[#allocation1 + $0x4] ss:$8 sm:$0xf]  }
  0x5e   :  { %v2662_v17 = vld [vmem:[#allocation1 + $0x385] ss:$8 sm:$0xf]   ;;  %v2655_v29 = vsel %vm2052_vm0, %v2653_v13, %v2651_v12  ;;  %v2719_v36 = vld [vmem:[#allocation1 + $0x4] ss:$8 sm:$0xf0]  }
  0x5f   :  { %4276 = vrot.lane.b32.xlu1 %v4275_v61, %s4481_s0  ;;  %4281 = vrot.lane.b32.xlu0 %v4280_v0, %s4482_s18  ;;  %v2664_v18 = vld [vmem:[#allocation1 + $0x385] ss:$8 sm:$0xf0]   ;;  %v2727_v37 = vld [vmem:[#allocation1 + $0x104] ss:$8 sm:$0xf]   ;;  %v2721_v47 = vsel %vm2052_vm0, %v2719_v36, %v2717_v35 }
  0x60   :  { %v2673_v21 = vld [vmem:[#allocation1 + $0xc5] ss:$8 sm:$0xf]   ;;  %v2666_v30 = vsel %vm2052_vm0, %v2664_v18, %v2662_v17  ;;  %v2729_v38 = vld [vmem:[#allocation1 + $0x104] ss:$8 sm:$0xf0]  }
  0x61   :  { %v2675_v22 = vld [vmem:[#allocation1 + $0xc5] ss:$8 sm:$0xf0]   ;;  %v4305_v39 = vpack.i.bf16 %v2666_v30, %v2655_v29  ;;  %v2738_v40 = vld [vmem:[#allocation1 + $0x204] ss:$8 sm:$0xf]   ;;  %v2731_v48 = vsel %vm2052_vm0, %v2729_v38, %v2727_v37 }
  0x62   :  { %v2684_v23 = vld [vmem:[#allocation1 + $0x1c5] ss:$8 sm:$0xf]   ;;  %v2677_v33 = vsel %vm2052_vm0, %v2675_v22, %v2673_v21  ;;  %v2740_v41 = vld [vmem:[#allocation1 + $0x204] ss:$8 sm:$0xf0]   ;;  %v4320_v56 = vpack.i.bf16 %v2731_v48, %v2721_v47 }
  0x63   :  { %v2686_v24 = vld [vmem:[#allocation1 + $0x1c5] ss:$8 sm:$0xf0]   ;;  %4286 = vrot.lane.b32.xlu1 %v4285_v11, %s4482_s18  ;;  %4291 = vrot.lane.b32.xlu0 %v4290_v14, %s4482_s18  ;;  %v2749_v45 = vld [vmem:[#allocation1 + $0x304] ss:$8 sm:$0xf]   ;;  %v2742_v57 = vsel %vm2052_vm0, %v2740_v41, %v2738_v40 }
  0x64   :  { %v2695_v26 = vld [vmem:[#allocation1 + $0x2c5] ss:$8 sm:$0xf]   ;;  %v2688_v34 = vsel %vm2052_vm0, %v2686_v24, %v2684_v23  ;;  %v2751_v46 = vld [vmem:[#allocation1 + $0x304] ss:$8 sm:$0xf0]  }
  0x65   :  { %v2697_v27 = vld [vmem:[#allocation1 + $0x2c5] ss:$8 sm:$0xf0]   ;;  %v4310_v42 = vpack.i.bf16 %v2688_v34, %v2677_v33  ;;  %v2760_v49 = vld [vmem:[#allocation1 + $0x44] ss:$8 sm:$0xf]   ;;  %v2753_v58 = vsel %vm2052_vm0, %v2751_v46, %v2749_v45 }
  0x66   :  { %v2706_v31 = vld [vmem:[#allocation1 + $0x3c5] ss:$8 sm:$0xf]   ;;  %v2699_v43 = vsel %vm2052_vm0, %v2697_v27, %v2695_v26  ;;  %v2762_v50 = vld [vmem:[#allocation1 + $0x44] ss:$8 sm:$0xf0]   ;;  %v4325_v3 = vpack.i.bf16 %v2753_v58, %v2742_v57 }
  0x67   :  { %v2708_v32 = vld [vmem:[#allocation1 + $0x3c5] ss:$8 sm:$0xf0]   ;;  %4296 = vrot.lane.b32.xlu1 %v4295_v25, %s4482_s18  ;;  %4301 = vrot.lane.b32.xlu0 %v4300_v28, %s4482_s18  ;;  %v2771_v51 = vld [vmem:[#allocation1 + $0x144] ss:$8 sm:$0xf]   ;;  %v2764_v61 = vsel %vm2052_vm0, %v2762_v50, %v2760_v49 }
  0x68   :  { %v2710_v44 = vsel %vm2052_vm0, %v2708_v32, %v2706_v31  ;;  %v2773_v52 = vld [vmem:[#allocation1 + $0x144] ss:$8 sm:$0xf0]   ;;  %v2892_v27 = vld [vmem:[#allocation1 + $0x3] ss:$8 sm:$0xf]  }
  0x69   :  { %v4315_v53 = vpack.i.bf16 %v2710_v44, %v2699_v43  ;;  %v2782_v54 = vld [vmem:[#allocation1 + $0x244] ss:$8 sm:$0xf]   ;;  %v2775_v62 = vsel %vm2052_vm0, %v2773_v52, %v2771_v51  ;;  %v2894_v28 = vld [vmem:[#allocation1 + $0x3] ss:$8 sm:$0xf0]  }
  0x6a   :  { %v2784_v55 = vld [vmem:[#allocation1 + $0x244] ss:$8 sm:$0xf0]   ;;  %v4330_v6 = vpack.i.bf16 %v2775_v62, %v2764_v61  ;;  %v2902_v29 = vld [vmem:[#allocation1 + $0x103] ss:$8 sm:$0xf]  }
  0x6b   :  { %4306 = vrot.lane.b32.xlu1 %v4305_v39, %s4482_s18  ;;  %4311 = vrot.lane.b32.xlu0 %v4310_v42, %s4482_s18  ;;  %v2793_v59 = vld [vmem:[#allocation1 + $0x344] ss:$8 sm:$0xf]   ;;  %v2786_v7 = vsel %vm2052_vm0, %v2784_v55, %v2782_v54  ;;  %v2904_v30 = vld [vmem:[#allocation1 + $0x103] ss:$8 sm:$0xf0]   ;;  %v2896_v39 = vsel %vm2052_vm0, %v2894_v28, %v2892_v27 }
  0x6c   :  { %v2795_v60 = vld [vmem:[#allocation1 + $0x344] ss:$8 sm:$0xf0]   ;;  %v2913_v32 = vld [vmem:[#allocation1 + $0x203] ss:$8 sm:$0xf]   ;;  %v2906_v40 = vsel %vm2052_vm0, %v2904_v30, %v2902_v29 }
  0x6d   :  { %v2804_v63 = vld [vmem:[#allocation1 + $0x84] ss:$8 sm:$0xf]   ;;  %v2797_v8 = vsel %vm2052_vm0, %v2795_v60, %v2793_v59  ;;  %v2915_v33 = vld [vmem:[#allocation1 + $0x203] ss:$8 sm:$0xf0]   ;;  %v4360_v48 = vpack.i.bf16 %v2906_v40, %v2896_v39 }
  0x6e   :  { %v2806_v0 = vld [vmem:[#allocation1 + $0x84] ss:$8 sm:$0xf0]   ;;  %v4335_v17 = vpack.i.bf16 %v2797_v8, %v2786_v7  ;;  %v2924_v37 = vld [vmem:[#allocation1 + $0x303] ss:$8 sm:$0xf]   ;;  %v2917_v49 = vsel %vm2052_vm0, %v2915_v33, %v2913_v32 }
  0x6f   :  { %v2815_v1 = vld [vmem:[#allocation1 + $0x184] ss:$8 sm:$0xf]   ;;  %4316 = vrot.lane.b32.xlu1 %v4315_v53, %s4482_s18  ;;  %4321 = vrot.lane.b32.xlu0 %v4320_v56, %s4483_s21  ;;  %v2808_v11 = vsel %vm2052_vm0, %v2806_v0, %v2804_v63  ;;  %v2926_v38 = vld [vmem:[#allocation1 + $0x303] ss:$8 sm:$0xf0]  }
  0x70   :  { %v2817_v2 = vld [vmem:[#allocation1 + $0x184] ss:$8 sm:$0xf0]   ;;  %v2935_v41 = vld [vmem:[#allocation1 + $0x43] ss:$8 sm:$0xf]   ;;  %v2928_v50 = vsel %vm2052_vm0, %v2926_v38, %v2924_v37 }
  0x71   :  { %v2826_v4 = vld [vmem:[#allocation1 + $0x284] ss:$8 sm:$0xf]   ;;  %v2819_v12 = vsel %vm2052_vm0, %v2817_v2, %v2815_v1  ;;  %v2937_v42 = vld [vmem:[#allocation1 + $0x43] ss:$8 sm:$0xf0]   ;;  %v4365_v59 = vpack.i.bf16 %v2928_v50, %v2917_v49 }
  0x72   :  { %v2828_v5 = vld [vmem:[#allocation1 + $0x284] ss:$8 sm:$0xf0]   ;;  %v4340_v20 = vpack.i.bf16 %v2819_v12, %v2808_v11  ;;  %v2946_v43 = vld [vmem:[#allocation1 + $0x143] ss:$8 sm:$0xf]   ;;  %v2939_v53 = vsel %vm2052_vm0, %v2937_v42, %v2935_v41 }
  0x73   :  { %v2837_v9 = vld [vmem:[#allocation1 + $0x384] ss:$8 sm:$0xf]   ;;  %4326 = vrot.lane.b32.xlu1 %v4325_v3, %s4483_s21  ;;  %4331 = vrot.lane.b32.xlu0 %v4330_v6, %s4483_s21  ;;  %v2830_v21 = vsel %vm2052_vm0, %v2828_v5, %v2826_v4  ;;  %v2948_v44 = vld [vmem:[#allocation1 + $0x143] ss:$8 sm:$0xf0]  }
  0x74   :  { %v2839_v10 = vld [vmem:[#allocation1 + $0x384] ss:$8 sm:$0xf0]   ;;  %v2957_v46 = vld [vmem:[#allocation1 + $0x243] ss:$8 sm:$0xf]   ;;  %v2950_v54 = vsel %vm2052_vm0, %v2948_v44, %v2946_v43 }
  0x75   :  { %v2848_v13 = vld [vmem:[#allocation1 + $0xc4] ss:$8 sm:$0xf]   ;;  %v2841_v22 = vsel %vm2052_vm0, %v2839_v10, %v2837_v9  ;;  %v2959_v47 = vld [vmem:[#allocation1 + $0x243] ss:$8 sm:$0xf0]   ;;  %v4370_v62 = vpack.i.bf16 %v2950_v54, %v2939_v53 }
  0x76   :  { %v2850_v14 = vld [vmem:[#allocation1 + $0xc4] ss:$8 sm:$0xf0]   ;;  %v4345_v31 = vpack.i.bf16 %v2841_v22, %v2830_v21  ;;  %v2968_v51 = vld [vmem:[#allocation1 + $0x343] ss:$8 sm:$0xf]   ;;  %v2961_v63 = vsel %vm2052_vm0, %v2959_v47, %v2957_v46 }
  0x77   :  { %v2859_v15 = vld [vmem:[#allocation1 + $0x1c4] ss:$8 sm:$0xf]   ;;  %v2852_v25 = vsel %vm2052_vm0, %v2850_v14, %v2848_v13  ;;  %4336 = vrot.lane.b32.xlu1 %v4335_v17, %s4483_s21  ;;  %4341 = vrot.lane.b32.xlu0 %v4340_v20, %s4483_s21  ;;  %v2970_v52 = vld [vmem:[#allocation1 + $0x343] ss:$8 sm:$0xf0]  }
  0x78   :  { %v2861_v16 = vld [vmem:[#allocation1 + $0x1c4] ss:$8 sm:$0xf0]   ;;  %v2979_v55 = vld [vmem:[#allocation1 + $0x83] ss:$8 sm:$0xf]   ;;  %v2972_v0 = vsel %vm2052_vm0, %v2970_v52, %v2968_v51 }
  0x79   :  { %v2870_v18 = vld [vmem:[#allocation1 + $0x2c4] ss:$8 sm:$0xf]   ;;  %v2863_v26 = vsel %vm2052_vm0, %v2861_v16, %v2859_v15  ;;  %v2981_v56 = vld [vmem:[#allocation1 + $0x83] ss:$8 sm:$0xf0]   ;;  %v4375_v9 = vpack.i.bf16 %v2972_v0, %v2961_v63 }
  0x7a   :  { %v2872_v19 = vld [vmem:[#allocation1 + $0x2c4] ss:$8 sm:$0xf0]   ;;  %v4350_v34 = vpack.i.bf16 %v2863_v26, %v2852_v25  ;;  %v2990_v57 = vld [vmem:[#allocation1 + $0x183] ss:$8 sm:$0xf]   ;;  %v2983_v3 = vsel %vm2052_vm0, %v2981_v56, %v2979_v55 }
  0x7b   :  { %v2881_v23 = vld [vmem:[#allocation1 + $0x3c4] ss:$8 sm:$0xf]   ;;  %v2874_v35 = vsel %vm2052_vm0, %v2872_v19, %v2870_v18  ;;  %4346 = vrot.lane.b32.xlu1 %v4345_v31, %s4483_s21  ;;  %v2992_v58 = vld [vmem:[#allocation1 + $0x183] ss:$8 sm:$0xf0]  }
  0x7c   :  { %v2883_v24 = vld [vmem:[#allocation1 + $0x3c4] ss:$8 sm:$0xf0]   ;;  %4351 = vrot.lane.b32.xlu0 %v4350_v34, %s4483_s21  ;;  %v3001_v60 = vld [vmem:[#allocation1 + $0x283] ss:$8 sm:$0xf]   ;;  %v2994_v4 = vsel %vm2052_vm0, %v2992_v58, %v2990_v57 }
  0x7d   :  { %v2885_v36 = vsel %vm2052_vm0, %v2883_v24, %v2881_v23  ;;  %v3003_v61 = vld [vmem:[#allocation1 + $0x283] ss:$8 sm:$0xf0]   ;;  %v4380_v12 = vpack.i.bf16 %v2994_v4, %v2983_v3  ;;  %v3067_v19 = vld [vmem:[#allocation1 + $0x2] ss:$8 sm:$0xf]  }
  0x7e   :  { %v4355_v45 = vpack.i.bf16 %v2885_v36, %v2874_v35  ;;  %v3012_v1 = vld [vmem:[#allocation1 + $0x383] ss:$8 sm:$0xf]   ;;  %v3005_v13 = vsel %vm2052_vm0, %v3003_v61, %v3001_v60  ;;  %v3069_v20 = vld [vmem:[#allocation1 + $0x2] ss:$8 sm:$0xf0]  }
  0x7f   :  { %v3014_v2 = vld [vmem:[#allocation1 + $0x383] ss:$8 sm:$0xf0]   ;;  %v3077_v21 = vld [vmem:[#allocation1 + $0x102] ss:$8 sm:$0xf]   ;;  %v3071_v31 = vsel %vm2052_vm0, %v3069_v20, %v3067_v19 }
  0x80   :  { %4356 = vrot.lane.b32.xlu1 %v4355_v45, %s4483_s21  ;;  %4361 = vrot.lane.b32.xlu0 %v4360_v48, %s4484_s22  ;;  %v3023_v5 = vld [vmem:[#allocation1 + $0xc3] ss:$8 sm:$0xf]   ;;  %v3016_v14 = vsel %vm2052_vm0, %v3014_v2, %v3012_v1  ;;  %v3079_v22 = vld [vmem:[#allocation1 + $0x102] ss:$8 sm:$0xf0]  }
  0x81   :  { %v3025_v6 = vld [vmem:[#allocation1 + $0xc3] ss:$8 sm:$0xf0]   ;;  %v4385_v23 = vpack.i.bf16 %v3016_v14, %v3005_v13  ;;  %v3088_v24 = vld [vmem:[#allocation1 + $0x202] ss:$8 sm:$0xf]   ;;  %v3081_v32 = vsel %vm2052_vm0, %v3079_v22, %v3077_v21 }
  0x82   :  { %v3034_v7 = vld [vmem:[#allocation1 + $0x1c3] ss:$8 sm:$0xf]   ;;  %v3027_v17 = vsel %vm2052_vm0, %v3025_v6, %v3023_v5  ;;  %v3090_v25 = vld [vmem:[#allocation1 + $0x202] ss:$8 sm:$0xf0]   ;;  %v4400_v40 = vpack.i.bf16 %v3081_v32, %v3071_v31 }
  0x83   :  { %v3036_v8 = vld [vmem:[#allocation1 + $0x1c3] ss:$8 sm:$0xf0]   ;;  %v3099_v29 = vld [vmem:[#allocation1 + $0x302] ss:$8 sm:$0xf]   ;;  %v3092_v41 = vsel %vm2052_vm0, %v3090_v25, %v3088_v24 }
  0x84   :  { %v3045_v10 = vld [vmem:[#allocation1 + $0x2c3] ss:$8 sm:$0xf]   ;;  %4366 = vrot.lane.b32.xlu1 %v4365_v59, %s4484_s22  ;;  %4371 = vrot.lane.b32.xlu0 %v4370_v62, %s4484_s22  ;;  %v3038_v18 = vsel %vm2052_vm0, %v3036_v8, %v3034_v7  ;;  %v3101_v30 = vld [vmem:[#allocation1 + $0x302] ss:$8 sm:$0xf0]  }
  0x85   :  { %v3047_v11 = vld [vmem:[#allocation1 + $0x2c3] ss:$8 sm:$0xf0]   ;;  %v4390_v26 = vpack.i.bf16 %v3038_v18, %v3027_v17  ;;  %v3110_v33 = vld [vmem:[#allocation1 + $0x42] ss:$8 sm:$0xf]   ;;  %v3103_v42 = vsel %vm2052_vm0, %v3101_v30, %v3099_v29 }
  0x86   :  { %v3056_v15 = vld [vmem:[#allocation1 + $0x3c3] ss:$8 sm:$0xf]   ;;  %v3049_v27 = vsel %vm2052_vm0, %v3047_v11, %v3045_v10  ;;  %v3112_v34 = vld [vmem:[#allocation1 + $0x42] ss:$8 sm:$0xf0]   ;;  %v4405_v51 = vpack.i.bf16 %v3103_v42, %v3092_v41 }
  0x87   :  { %v3058_v16 = vld [vmem:[#allocation1 + $0x3c3] ss:$8 sm:$0xf0]   ;;  %v3121_v35 = vld [vmem:[#allocation1 + $0x142] ss:$8 sm:$0xf]   ;;  %v3114_v45 = vsel %vm2052_vm0, %v3112_v34, %v3110_v33 }
  0x88   :  { %4376 = vrot.lane.b32.xlu1 %v4375_v9, %s4484_s22  ;;  %4381 = vrot.lane.b32.xlu0 %v4380_v12, %s4484_s22  ;;  %v3060_v28 = vsel %vm2052_vm0, %v3058_v16, %v3056_v15  ;;  %v3123_v36 = vld [vmem:[#allocation1 + $0x142] ss:$8 sm:$0xf0]   ;;  %v3242_v11 = vld [vmem:[#allocation1 + $0x1] ss:$8 sm:$0xf]  }
  0x89   :  { %v4395_v37 = vpack.i.bf16 %v3060_v28, %v3049_v27  ;;  %v3132_v38 = vld [vmem:[#allocation1 + $0x242] ss:$8 sm:$0xf]   ;;  %v3125_v46 = vsel %vm2052_vm0, %v3123_v36, %v3121_v35  ;;  %v3244_v12 = vld [vmem:[#allocation1 + $0x1] ss:$8 sm:$0xf0]  }
  0x8a   :  { %v3134_v39 = vld [vmem:[#allocation1 + $0x242] ss:$8 sm:$0xf0]   ;;  %v4410_v54 = vpack.i.bf16 %v3125_v46, %v3114_v45  ;;  %v3252_v13 = vld [vmem:[#allocation1 + $0x101] ss:$8 sm:$0xf]  }
  0x8b   :  { %v3143_v43 = vld [vmem:[#allocation1 + $0x342] ss:$8 sm:$0xf]   ;;  %v3136_v55 = vsel %vm2052_vm0, %v3134_v39, %v3132_v38  ;;  %v3254_v14 = vld [vmem:[#allocation1 + $0x101] ss:$8 sm:$0xf0]  }
  0x8c   :  { %4386 = vrot.lane.b32.xlu1 %v4385_v23, %s4484_s22  ;;  %4391 = vrot.lane.b32.xlu0 %v4390_v26, %s4484_s22  ;;  %v3145_v44 = vld [vmem:[#allocation1 + $0x342] ss:$8 sm:$0xf0]   ;;  %v3263_v16 = vld [vmem:[#allocation1 + $0x201] ss:$8 sm:$0xf]   ;;  %v3246_v23 = vsel %vm2052_vm0, %v3244_v12, %v3242_v11  ;;  %v3256_v24 = vsel %vm2052_vm0, %v3254_v14, %v3252_v13 }
  0x8d   :  { %v3154_v47 = vld [vmem:[#allocation1 + $0x82] ss:$8 sm:$0xf]   ;;  %v3147_v56 = vsel %vm2052_vm0, %v3145_v44, %v3143_v43  ;;  %v3265_v17 = vld [vmem:[#allocation1 + $0x201] ss:$8 sm:$0xf0]   ;;  %v4440_v32 = vpack.i.bf16 %v3256_v24, %v3246_v23 }
  0x8e   :  { %v3156_v48 = vld [vmem:[#allocation1 + $0x82] ss:$8 sm:$0xf0]   ;;  %v4415_v1 = vpack.i.bf16 %v3147_v56, %v3136_v55  ;;  %v3274_v21 = vld [vmem:[#allocation1 + $0x301] ss:$8 sm:$0xf]   ;;  %v3267_v33 = vsel %vm2052_vm0, %v3265_v17, %v3263_v16 }
  0x8f   :  { %v3165_v49 = vld [vmem:[#allocation1 + $0x182] ss:$8 sm:$0xf]   ;;  %v3158_v59 = vsel %vm2052_vm0, %v3156_v48, %v3154_v47  ;;  %v3276_v22 = vld [vmem:[#allocation1 + $0x301] ss:$8 sm:$0xf0]  }
  0x90   :  { %v3167_v50 = vld [vmem:[#allocation1 + $0x182] ss:$8 sm:$0xf0]   ;;  %4396 = vrot.lane.b32.xlu1 %v4395_v37, %s4484_s22  ;;  %4401 = vrot.lane.b32.xlu0 %v4400_v40, %s4485_s23  ;;  %v3285_v25 = vld [vmem:[#allocation1 + $0x41] ss:$8 sm:$0xf]   ;;  %v3278_v34 = vsel %vm2052_vm0, %v3276_v22, %v3274_v21  ;;  %v4212_v16 = vpop.permute.xlu1 %4211 }
  0x91   :  { %v3176_v52 = vld [vmem:[#allocation1 + $0x282] ss:$8 sm:$0xf]   ;;  %v3169_v60 = vsel %vm2052_vm0, %v3167_v50, %v3165_v49  ;;  %v3287_v26 = vld [vmem:[#allocation1 + $0x41] ss:$8 sm:$0xf0]   ;;  %v4445_v43 = vpack.i.bf16 %v3278_v34, %v3267_v33 }
  0x92   :  { %v3178_v53 = vld [vmem:[#allocation1 + $0x282] ss:$8 sm:$0xf0]   ;;  %v4420_v4 = vpack.i.bf16 %v3169_v60, %v3158_v59  ;;  %v3296_v27 = vld [vmem:[#allocation1 + $0x141] ss:$8 sm:$0xf]   ;;  %v3289_v37 = vsel %vm2052_vm0, %v3287_v26, %v3285_v25  ;;  %v4202_v59 = vpop.permute.xlu0 %4201 }
  0x93   :  { %v3187_v57 = vld [vmem:[#allocation1 + $0x382] ss:$8 sm:$0xf]   ;;  %v3180_v5 = vsel %vm2052_vm0, %v3178_v53, %v3176_v52  ;;  %v3298_v28 = vld [vmem:[#allocation1 + $0x141] ss:$8 sm:$0xf0]  }
  0x94   :  { %v3189_v58 = vld [vmem:[#allocation1 + $0x382] ss:$8 sm:$0xf0]   ;;  %4406 = vrot.lane.b32.xlu1 %v4405_v51, %s4485_s23  ;;  %4411 = vrot.lane.b32.xlu0 %v4410_v54, %s4485_s23  ;;  %v3307_v30 = vld [vmem:[#allocation1 + $0x241] ss:$8 sm:$0xf]   ;;  %v3300_v38 = vsel %vm2052_vm0, %v3298_v28, %v3296_v27 }
  0x95   :  { %v3198_v61 = vld [vmem:[#allocation1 + $0xc2] ss:$8 sm:$0xf]   ;;  %v3191_v6 = vsel %vm2052_vm0, %v3189_v58, %v3187_v57  ;;  %v3309_v31 = vld [vmem:[#allocation1 + $0x241] ss:$8 sm:$0xf0]   ;;  %v4450_v46 = vpack.i.bf16 %v3300_v38, %v3289_v37 }
  0x96   :  { %v3200_v62 = vld [vmem:[#allocation1 + $0xc2] ss:$8 sm:$0xf0]   ;;  %v4425_v15 = vpack.i.bf16 %v3191_v6, %v3180_v5  ;;  %v3318_v35 = vld [vmem:[#allocation1 + $0x341] ss:$8 sm:$0xf]   ;;  %v3311_v47 = vsel %vm2052_vm0, %v3309_v31, %v3307_v30  ;;  %v4204_v5 = vunpack.i.h.bf16 %v4202_v59  ;;  %v4203_v6 = vunpack.i.l.bf16 %v4202_v59 }
  0x97   :  { %v3209_v63 = vld [vmem:[#allocation1 + $0x1c2] ss:$8 sm:$0xf]   ;;  %v3202_v9 = vsel %vm2052_vm0, %v3200_v62, %v3198_v61  ;;  %v3320_v36 = vld [vmem:[#allocation1 + $0x341] ss:$8 sm:$0xf0]  }
  0x98   :  { %v3211_v0 = vld [vmem:[#allocation1 + $0x1c2] ss:$8 sm:$0xf0]   ;;  %4416 = vrot.lane.b32.xlu1 %v4415_v1, %s4485_s23  ;;  %4421 = vrot.lane.b32.xlu0 %v4420_v4, %s4485_s23  ;;  %v3329_v39 = vld [vmem:[#allocation1 + $0x81] ss:$8 sm:$0xf]   ;;  %v3322_v48 = vsel %vm2052_vm0, %v3320_v36, %v3318_v35  ;;  %v4207_v37 = vpop.permute.xlu0 %4206 }
  0x99   :  { %v3220_v2 = vld [vmem:[#allocation1 + $0x2c2] ss:$8 sm:$0xf]   ;;  %v3213_v10 = vsel %vm2052_vm0, %v3211_v0, %v3209_v63  ;;  %v3331_v40 = vld [vmem:[#allocation1 + $0x81] ss:$8 sm:$0xf0]   ;;  %v4455_v60 = vpack.i.bf16 %v3322_v48, %v3311_v47 }
  0x9a   :  { %v3222_v3 = vld [vmem:[#allocation1 + $0x2c2] ss:$8 sm:$0xf0]   ;;  %v4430_v18 = vpack.i.bf16 %v3213_v10, %v3202_v9  ;;  %v3340_v41 = vld [vmem:[#allocation1 + $0x181] ss:$8 sm:$0xf]   ;;  %v3333_v53 = vsel %vm2052_vm0, %v3331_v40, %v3329_v39 }
  0x9b   :  { %v3231_v7 = vld [vmem:[#allocation1 + $0x3c2] ss:$8 sm:$0xf]   ;;  %v3224_v19 = vsel %vm2052_vm0, %v3222_v3, %v3220_v2  ;;  %v3342_v42 = vld [vmem:[#allocation1 + $0x181] ss:$8 sm:$0xf0]  }
  0x9c   :  { %v3233_v8 = vld [vmem:[#allocation1 + $0x3c2] ss:$8 sm:$0xf0]   ;;  %4426 = vrot.lane.b32.xlu1 %v4425_v15, %s4485_s23  ;;  %4431 = vrot.lane.b32.xlu0 %v4430_v18, %s4485_s23  ;;  %v3351_v44 = vld [vmem:[#allocation1 + $0x281] ss:$8 sm:$0xf]   ;;  %v3344_v54 = vsel %vm2052_vm0, %v3342_v42, %v3340_v41  ;;  %v4209_v42 = vunpack.i.h.bf16 %v4207_v37 }
  0x9d   :  { %v3235_v20 = vsel %vm2052_vm0, %v3233_v8, %v3231_v7  ;;  %v3353_v45 = vld [vmem:[#allocation1 + $0x281] ss:$8 sm:$0xf0]   ;;  %v2050_v57 = vld [vmem:[#allocation1] ss:$8 sm:$0xf]   ;;  %v4460_v63 = vpack.i.bf16 %v3344_v54, %v3333_v53 }
  0x9e   :  { %v4435_v29 = vpack.i.bf16 %v3235_v20, %v3224_v19  ;;  %v3362_v49 = vld [vmem:[#allocation1 + $0x381] ss:$8 sm:$0xf]   ;;  %v2051_v58 = vld [vmem:[#allocation1] ss:$8 sm:$0xf0]   ;;  %v3355_v0 = vsel %vm2052_vm0, %v3353_v45, %v3351_v44  ;;  %v4214_v19 = vunpack.i.h.bf16 %v4212_v16  ;;  %v4213_v20 = vunpack.i.l.bf16 %v4212_v16 }
  0x9f   :  { %v3364_v50 = vld [vmem:[#allocation1 + $0x381] ss:$8 sm:$0xf0]   ;;  %v2053_v61 = vsel %vm2052_vm0, %v2051_v58, %v2050_v57  ;;  %v2084_v62 = vld [vmem:[#allocation1 + $0x100] ss:$8 sm:$0xf]  }
  0xa0   :  { %4436 = vrot.lane.b32.xlu1 %v4435_v29, %s4485_s23  ;;  %4441 = vrot.lane.b32.xlu0 %v4440_v32, %s4486_s24  ;;  %v3373_v51 = vld [vmem:[#allocation1 + $0xc1] ss:$8 sm:$0xf]   ;;  %2055 = vst.msk [vmem:[#allocation0] sm:$0xff] %vm2054_vm1, %v2053_v61   ;;  %v3366_v9 = vsel %vm2052_vm0, %v3364_v50, %v3362_v49  ;;  %v4217_v53 = vpop.permute.xlu1 %4216 }
  0xa1   :  { %v3375_v52 = vld [vmem:[#allocation1 + $0xc1] ss:$8 sm:$0xf0]   ;;  %v2086_v7 = vld [vmem:[#allocation1 + $0x100] ss:$8 sm:$0xf0]   ;;  %v4465_v24 = vpack.i.bf16 %v3366_v9, %v3355_v0  ;;  %v4219_v57 = vunpack.i.h.bf16 %v4217_v53  ;;  %v4218_v58 = vunpack.i.l.bf16 %v4217_v53 }
  0xa2   :  { %v3384_v55 = vld [vmem:[#allocation1 + $0x1c1] ss:$8 sm:$0xf]   ;;  %v2057_v8 = vld [vmem:[#allocation1 + $0x40] ss:$8 sm:$0xf]   ;;  %v3377_v10 = vsel %vm2052_vm0, %v3375_v52, %v3373_v51  ;;  %v2088_v12 = vsel %vm2052_vm0, %v2086_v7, %v2084_v62 }
  0xa3   :  { %v3386_v56 = vld [vmem:[#allocation1 + $0x1c1] ss:$8 sm:$0xf0]   ;;  %v2059_v13 = vld [vmem:[#allocation1 + $0x40] ss:$8 sm:$0xf0]  }
  0xa4   :  { %4446 = vrot.lane.b32.xlu1 %v4445_v43, %s4486_s24  ;;  %4451 = vrot.lane.b32.xlu0 %v4450_v46, %s4486_s24  ;;  %v3395_v1 = vld [vmem:[#allocation1 + $0x2c1] ss:$8 sm:$0xf]   ;;  %v3388_v11 = vsel %vm2052_vm0, %v3386_v56, %v3384_v55  ;;  %v2093_v14 = vld [vmem:[#allocation1 + $0x140] ss:$8 sm:$0xf]   ;;  %v2061_v15 = vsel %vm2052_vm0, %v2059_v13, %v2057_v8  ;;  %v4208_v43 = vunpack.i.l.bf16 %v4207_v37 }
  0xa5   :  { %v3397_v2 = vld [vmem:[#allocation1 + $0x2c1] ss:$8 sm:$0xf0]   ;;  %2091 = vst.msk [vmem:[#allocation0 + $0x20] sm:$0xff] %vm2054_vm1, %v2088_v12   ;;  %2064 = vst.msk [vmem:[#allocation0 + $0x8] sm:$0xff] %vm2054_vm1, %v2061_v15   ;;  %v4470_v25 = vpack.i.bf16 %v3388_v11, %v3377_v10 }
  0xa6   :  { %v3406_v3 = vld [vmem:[#allocation1 + $0x3c1] ss:$8 sm:$0xf]   ;;  %2200 = vst.msk [vmem:[#allocation0] sm:$0xff] %vm2199_vm2, %v4203_v6   ;;  %2211 = vst.msk [vmem:[#allocation0 + $0x20] sm:$0xff] %vm2199_vm2, %v4204_v5   ;;  %v3399_v29 = vsel %vm2052_vm0, %v3397_v2, %v3395_v1 }
  0xa7   :  { %v3408_v4 = vld [vmem:[#allocation1 + $0x3c1] ss:$8 sm:$0xf0]   ;;  %v2095_v17 = vld [vmem:[#allocation1 + $0x140] ss:$8 sm:$0xf0]  }
  0xa8   :  { %v2120_v18 = vld [vmem:[#allocation1 + $0x200] ss:$8 sm:$0xf]   ;;  %v2097_v21 = vsel %vm2052_vm0, %v2095_v17, %v2093_v14  ;;  %4456 = vrot.lane.b32.xlu1 %v4455_v60, %s4486_s24  ;;  %4461 = vrot.lane.b32.xlu0 %v4460_v63, %s4486_s24  ;;  %v3410_v30 = vsel %vm2052_vm0, %v3408_v4, %v3406_v3  ;;  %2244 = vst.msk [vmem:[#allocation0 + $0x8] sm:$0xff] %vm2199_vm2, %v4213_v20   ;;  %v4222_v4 = vpop.permute.xlu0 %4221 }
  0xa9   :  { %v2122_v22 = vld [vmem:[#allocation1 + $0x200] ss:$8 sm:$0xf0]   ;;  %2100 = vst.msk [vmem:[#allocation0 + $0x28] sm:$0xff] %vm2054_vm1, %v2097_v21   ;;  %v4475_v41 = vpack.i.bf16 %v3410_v30, %v3399_v29  ;;  %v4224_v5 = vunpack.i.h.bf16 %v4222_v4  ;;  %v4223_v6 = vunpack.i.l.bf16 %v4222_v4 }
  0xaa   :  { %v2156_v23 = vld [vmem:[#allocation1 + $0x300] ss:$8 sm:$0xf]   ;;  %v2124_v26 = vsel %vm2052_vm0, %v2122_v22, %v2120_v18  ;;  %2255 = vst.msk [vmem:[#allocation0 + $0x28] sm:$0xff] %vm2199_vm2, %v4214_v19  }
  0xab   :  { %v2158_v27 = vld [vmem:[#allocation1 + $0x300] ss:$8 sm:$0xf0]   ;;  %2127 = vst.msk [vmem:[#allocation0 + $0x40] sm:$0xff] %vm2054_vm1, %v2124_v26  }
  0xac   :  { %v2129_v28 = vld [vmem:[#allocation1 + $0x240] ss:$8 sm:$0xf]   ;;  %v2160_v31 = vsel %vm2052_vm0, %v2158_v27, %v2156_v23  ;;  %4466 = vrot.lane.b32.xlu1 %v4465_v24, %s4486_s24  ;;  %4471 = vrot.lane.b32.xlu0 %v4470_v25, %s4486_s24  ;;  %2222 = vst.msk [vmem:[#allocation0 + $0x40] sm:$0xff] %vm2199_vm2, %v4208_v43  }
  0xad   :  { %v2131_v32 = vld [vmem:[#allocation1 + $0x240] ss:$8 sm:$0xf0]   ;;  %2163 = vst.msk [vmem:[#allocation0 + $0x60] sm:$0xff] %vm2054_vm1, %v2160_v31  }
  0xae   :  { %v2165_v33 = vld [vmem:[#allocation1 + $0x340] ss:$8 sm:$0xf]   ;;  %v2133_v34 = vsel %vm2052_vm0, %v2131_v32, %v2129_v28  ;;  %2233 = vst.msk [vmem:[#allocation0 + $0x60] sm:$0xff] %vm2199_vm2, %v4209_v42  }
  0xaf   :  { %v2167_v35 = vld [vmem:[#allocation1 + $0x340] ss:$8 sm:$0xf0]   ;;  %2136 = vst.msk [vmem:[#allocation0 + $0x48] sm:$0xff] %vm2054_vm1, %v2133_v34  }
  0xb0   :  { %v2066_v36 = vld [vmem:[#allocation1 + $0x80] ss:$8 sm:$0xf]   ;;  %v2169_v38 = vsel %vm2052_vm0, %v2167_v35, %v2165_v33  ;;  %4476 = vrot.lane.b32.xlu1 %v4475_v41, %s4486_s24  ;;  %2266 = vst.msk [vmem:[#allocation0 + $0x48] sm:$0xff] %vm2199_vm2, %v4218_v58   ;;  %v4227_v7 = vpop.permute.xlu1 %4226 }
  0xb1   :  { %v2068_v39 = vld [vmem:[#allocation1 + $0x80] ss:$8 sm:$0xf0]   ;;  %2172 = vst.msk [vmem:[#allocation0 + $0x68] sm:$0xff] %vm2054_vm1, %v2169_v38   ;;  %v4229_v8 = vunpack.i.h.bf16 %v4227_v7  ;;  %v4228_v9 = vunpack.i.l.bf16 %v4227_v7 }
  0xb2   :  { %v2102_v40 = vld [vmem:[#allocation1 + $0x180] ss:$8 sm:$0xf]   ;;  %v2070_v44 = vsel %vm2052_vm0, %v2068_v39, %v2066_v36  ;;  %2277 = vst.msk [vmem:[#allocation0 + $0x68] sm:$0xff] %vm2199_vm2, %v4219_v57  }
  0xb3   :  { %v2104_v45 = vld [vmem:[#allocation1 + $0x180] ss:$8 sm:$0xf0]   ;;  %2073 = vst.msk [vmem:[#allocation0 + $0x10] sm:$0xff] %vm2054_vm1, %v2070_v44  }
  0xb4   :  { %v2138_v46 = vld [vmem:[#allocation1 + $0x280] ss:$8 sm:$0xf]   ;;  %v2106_v47 = vsel %vm2052_vm0, %v2104_v45, %v2102_v40  ;;  %2288 = vst.msk [vmem:[#allocation0 + $0x10] sm:$0xff] %vm2199_vm2, %v4223_v6  }
  0xb5   :  { %v2140_v48 = vld [vmem:[#allocation1 + $0x280] ss:$8 sm:$0xf0]   ;;  %2109 = vst.msk [vmem:[#allocation0 + $0x30] sm:$0xff] %vm2054_vm1, %v2106_v47  }
  0xb6   :  { %v2174_v49 = vld [vmem:[#allocation1 + $0x380] ss:$8 sm:$0xf]   ;;  %v2142_v50 = vsel %vm2052_vm0, %v2140_v48, %v2138_v46  ;;  %2299 = vst.msk [vmem:[#allocation0 + $0x30] sm:$0xff] %vm2199_vm2, %v4224_v5  }
  0xb7   :  { %v2176_v51 = vld [vmem:[#allocation1 + $0x380] ss:$8 sm:$0xf0]   ;;  %2145 = vst.msk [vmem:[#allocation0 + $0x50] sm:$0xff] %vm2054_vm1, %v2142_v50  }
  0xb8   :  { %v2075_v52 = vld [vmem:[#allocation1 + $0xc0] ss:$8 sm:$0xf]   ;;  %v2178_v54 = vsel %vm2052_vm0, %v2176_v51, %v2174_v49  ;;  %2310 = vst.msk [vmem:[#allocation0 + $0x50] sm:$0xff] %vm2199_vm2, %v4228_v9  }
  0xb9   :  { %v2077_v55 = vld [vmem:[#allocation1 + $0xc0] ss:$8 sm:$0xf0]   ;;  %2181 = vst.msk [vmem:[#allocation0 + $0x70] sm:$0xff] %vm2054_vm1, %v2178_v54   ;;  %v4232_v10 = vpop.permute.xlu0 %4231 }
  0xba   :  { %v2111_v56 = vld [vmem:[#allocation1 + $0x1c0] ss:$8 sm:$0xf]   ;;  %v2079_v59 = vsel %vm2052_vm0, %v2077_v55, %v2075_v52  ;;  %2321 = vst.msk [vmem:[#allocation0 + $0x70] sm:$0xff] %vm2199_vm2, %v4229_v8   ;;  %v4234_v11 = vunpack.i.h.bf16 %v4232_v10  ;;  %v4233_v12 = vunpack.i.l.bf16 %v4232_v10 }
  0xbb   :  { %v2113_v60 = vld [vmem:[#allocation1 + $0x1c0] ss:$8 sm:$0xf0]   ;;  %2082 = vst.msk [vmem:[#allocation0 + $0x18] sm:$0xff] %vm2054_vm1, %v2079_v59  }
  0xbc   :  { %v2147_v61 = vld [vmem:[#allocation1 + $0x2c0] ss:$8 sm:$0xf]   ;;  %v2115_v62 = vsel %vm2052_vm0, %v2113_v60, %v2111_v56  ;;  %2332 = vst.msk [vmem:[#allocation0 + $0x18] sm:$0xff] %vm2199_vm2, %v4233_v12  }
  0xbd   :  { %v2149_v63 = vld [vmem:[#allocation1 + $0x2c0] ss:$8 sm:$0xf0]   ;;  %2118 = vst.msk [vmem:[#allocation0 + $0x38] sm:$0xff] %vm2054_vm1, %v2115_v62   ;;  %v4242_v14 = vpop.permute.xlu0 %4241 }
  0xbe   :  { %v2183_v0 = vld [vmem:[#allocation1 + $0x3c0] ss:$8 sm:$0xf]   ;;  %v2151_v1 = vsel %vm2052_vm0, %v2149_v63, %v2147_v61  ;;  %2343 = vst.msk [vmem:[#allocation0 + $0x38] sm:$0xff] %vm2199_vm2, %v4234_v11   ;;  %v4244_v17 = vunpack.i.h.bf16 %v4242_v14  ;;  %v4243_v18 = vunpack.i.l.bf16 %v4242_v14 }
  0xbf   :  { %v2185_v2 = vld [vmem:[#allocation1 + $0x3c0] ss:$8 sm:$0xf0]   ;;  %2154 = vst.msk [vmem:[#allocation0 + $0x58] sm:$0xff] %vm2054_vm1, %v2151_v1  }
  0xc0   :  { %v2187_v3 = vsel %vm2052_vm0, %v2185_v2, %v2183_v0  ;;  %v4237_v13 = vpop.permute.xlu1 %4236  ;;  %2386 = vst.msk [vmem:[#allocation0 + $0x20] sm:$0xff] %vm2374_vm3, %v4244_v17   ;;  %2375 = vst.msk [vmem:[#allocation0] sm:$0xff] %vm2374_vm3, %v4243_v18  }
  0xc1   :  { %2190 = vst.msk [vmem:[#allocation0 + $0x78] sm:$0xff] %vm2054_vm1, %v2187_v3   ;;  %v4239_v15 = vunpack.i.h.bf16 %v4237_v13  ;;  %v4238_v16 = vunpack.i.l.bf16 %v4237_v13  ;;  %v4252_v20 = vpop.permute.xlu0 %4251 }
  0xc2   :  { %v4254_v23 = vunpack.i.h.bf16 %v4252_v20  ;;  %v4253_v24 = vunpack.i.l.bf16 %v4252_v20 }
  0xc3   :  { %2354 = vst.msk [vmem:[#allocation0 + $0x58] sm:$0xff] %vm2199_vm2, %v4238_v16   ;;  %2365 = vst.msk [vmem:[#allocation0 + $0x78] sm:$0xff] %vm2199_vm2, %v4239_v15  }
  0xc4   :  { %v4247_v19 = vpop.permute.xlu1 %4246  ;;  %2430 = vst.msk [vmem:[#allocation0 + $0x28] sm:$0xff] %vm2374_vm3, %v4254_v23   ;;  %2419 = vst.msk [vmem:[#allocation0 + $0x8] sm:$0xff] %vm2374_vm3, %v4253_v24  }
  0xc5   :  { %v4249_v21 = vunpack.i.h.bf16 %v4247_v19  ;;  %v4248_v22 = vunpack.i.l.bf16 %v4247_v19  ;;  %v4262_v26 = vpop.permute.xlu0 %4261 }
  0xc6   :  { %v4264_v29 = vunpack.i.h.bf16 %v4262_v26  ;;  %v4263_v30 = vunpack.i.l.bf16 %v4262_v26 }
  0xc7   :  { %2408 = vst.msk [vmem:[#allocation0 + $0x60] sm:$0xff] %vm2374_vm3, %v4249_v21   ;;  %2397 = vst.msk [vmem:[#allocation0 + $0x40] sm:$0xff] %vm2374_vm3, %v4248_v22  }
  0xc8   :  { %v4257_v25 = vpop.permute.xlu1 %4256  ;;  %2463 = vst.msk [vmem:[#allocation0 + $0x10] sm:$0xff] %vm2374_vm3, %v4263_v30   ;;  %2474 = vst.msk [vmem:[#allocation0 + $0x30] sm:$0xff] %vm2374_vm3, %v4264_v29  }
  0xc9   :  { %v4259_v27 = vunpack.i.h.bf16 %v4257_v25  ;;  %v4258_v28 = vunpack.i.l.bf16 %v4257_v25 }
  0xcb   :  { %2452 = vst.msk [vmem:[#allocation0 + $0x68] sm:$0xff] %vm2374_vm3, %v4259_v27   ;;  %2441 = vst.msk [vmem:[#allocation0 + $0x48] sm:$0xff] %vm2374_vm3, %v4258_v28  }
  0xcc   :  { %v4267_v31 = vpop.permute.xlu1 %4266 }
  0xcd   :  { %v4272_v32 = vpop.permute.xlu0 %4271  ;;  %v4269_v33 = vunpack.i.h.bf16 %v4267_v31  ;;  %v4268_v34 = vunpack.i.l.bf16 %v4267_v31 }
  0xce   :  { %v4274_v35 = vunpack.i.h.bf16 %v4272_v32  ;;  %v4273_v36 = vunpack.i.l.bf16 %v4272_v32 }
  0xcf   :  { %2496 = vst.msk [vmem:[#allocation0 + $0x70] sm:$0xff] %vm2374_vm3, %v4269_v33   ;;  %2485 = vst.msk [vmem:[#allocation0 + $0x50] sm:$0xff] %vm2374_vm3, %v4268_v34  }
  0xd0   :  { %2507 = vst.msk [vmem:[#allocation0 + $0x18] sm:$0xff] %vm2374_vm3, %v4273_v36   ;;  %2518 = vst.msk [vmem:[#allocation0 + $0x38] sm:$0xff] %vm2374_vm3, %v4274_v35  }
  0xd1   :  { %v4277_v37 = vpop.permute.xlu1 %4276  ;;  %v4282_v38 = vpop.permute.xlu0 %4281 }
  0xd2   :  { %v4279_v39 = vunpack.i.h.bf16 %v4277_v37  ;;  %v4278_v40 = vunpack.i.l.bf16 %v4277_v37  ;;  %v4284_v41 = vunpack.i.h.bf16 %v4282_v38  ;;  %v4283_v42 = vunpack.i.l.bf16 %v4282_v38 }
  0xd4   :  { %2529 = vst.msk [vmem:[#allocation0 + $0x58] sm:$0xff] %vm2374_vm3, %v4278_v40   ;;  %2540 = vst.msk [vmem:[#allocation0 + $0x78] sm:$0xff] %vm2374_vm3, %v4279_v39  }
  0xd5   :  { %2550 = vst.msk [vmem:[#allocation0] sm:$0xff] %vm2549_vm4, %v4283_v42   ;;  %2561 = vst.msk [vmem:[#allocation0 + $0x20] sm:$0xff] %vm2549_vm4, %v4284_v41   ;;  %v4287_v43 = vpop.permute.xlu1 %4286  ;;  %v4292_v44 = vpop.permute.xlu0 %4291 }
  0xd6   :  { %v4289_v45 = vunpack.i.h.bf16 %v4287_v43  ;;  %v4288_v46 = vunpack.i.l.bf16 %v4287_v43  ;;  %v4294_v47 = vunpack.i.h.bf16 %v4292_v44  ;;  %v4293_v48 = vunpack.i.l.bf16 %v4292_v44 }
  0xd8   :  { %2572 = vst.msk [vmem:[#allocation0 + $0x40] sm:$0xff] %vm2549_vm4, %v4288_v46   ;;  %2583 = vst.msk [vmem:[#allocation0 + $0x60] sm:$0xff] %vm2549_vm4, %v4289_v45  }
  0xd9   :  { %2594 = vst.msk [vmem:[#allocation0 + $0x8] sm:$0xff] %vm2549_vm4, %v4293_v48   ;;  %2605 = vst.msk [vmem:[#allocation0 + $0x28] sm:$0xff] %vm2549_vm4, %v4294_v47   ;;  %v4297_v49 = vpop.permute.xlu1 %4296  ;;  %v4302_v50 = vpop.permute.xlu0 %4301 }
  0xda   :  { %v4299_v51 = vunpack.i.h.bf16 %v4297_v49  ;;  %v4298_v52 = vunpack.i.l.bf16 %v4297_v49  ;;  %v4304_v53 = vunpack.i.h.bf16 %v4302_v50  ;;  %v4303_v54 = vunpack.i.l.bf16 %v4302_v50 }
  0xdc   :  { %2616 = vst.msk [vmem:[#allocation0 + $0x48] sm:$0xff] %vm2549_vm4, %v4298_v52   ;;  %2627 = vst.msk [vmem:[#allocation0 + $0x68] sm:$0xff] %vm2549_vm4, %v4299_v51  }
  0xdd   :  { %2638 = vst.msk [vmem:[#allocation0 + $0x10] sm:$0xff] %vm2549_vm4, %v4303_v54   ;;  %2649 = vst.msk [vmem:[#allocation0 + $0x30] sm:$0xff] %vm2549_vm4, %v4304_v53   ;;  %v4307_v55 = vpop.permute.xlu1 %4306  ;;  %v4312_v56 = vpop.permute.xlu0 %4311 }
  0xde   :  { %v4309_v57 = vunpack.i.h.bf16 %v4307_v55  ;;  %v4308_v58 = vunpack.i.l.bf16 %v4307_v55  ;;  %v4314_v59 = vunpack.i.h.bf16 %v4312_v56  ;;  %v4313_v60 = vunpack.i.l.bf16 %v4312_v56 }
  0xe0   :  { %2660 = vst.msk [vmem:[#allocation0 + $0x50] sm:$0xff] %vm2549_vm4, %v4308_v58   ;;  %2671 = vst.msk [vmem:[#allocation0 + $0x70] sm:$0xff] %vm2549_vm4, %v4309_v57  }
  0xe1   :  { %2682 = vst.msk [vmem:[#allocation0 + $0x18] sm:$0xff] %vm2549_vm4, %v4313_v60   ;;  %2693 = vst.msk [vmem:[#allocation0 + $0x38] sm:$0xff] %vm2549_vm4, %v4314_v59   ;;  %v4317_v61 = vpop.permute.xlu1 %4316  ;;  %v4322_v62 = vpop.permute.xlu0 %4321 }
  0xe2   :  { %v4319_v63 = vunpack.i.h.bf16 %v4317_v61  ;;  %v4318_v0 = vunpack.i.l.bf16 %v4317_v61  ;;  %v4324_v1 = vunpack.i.h.bf16 %v4322_v62  ;;  %v4323_v2 = vunpack.i.l.bf16 %v4322_v62 }
  0xe4   :  { %2704 = vst.msk [vmem:[#allocation0 + $0x58] sm:$0xff] %vm2549_vm4, %v4318_v0   ;;  %2715 = vst.msk [vmem:[#allocation0 + $0x78] sm:$0xff] %vm2549_vm4, %v4319_v63  }
  0xe5   :  { %2725 = vst.msk [vmem:[#allocation0] sm:$0xff] %vm2724_vm5, %v4323_v2   ;;  %2736 = vst.msk [vmem:[#allocation0 + $0x20] sm:$0xff] %vm2724_vm5, %v4324_v1   ;;  %v4327_v3 = vpop.permute.xlu1 %4326  ;;  %v4332_v4 = vpop.permute.xlu0 %4331 }
  0xe6   :  { %v4329_v5 = vunpack.i.h.bf16 %v4327_v3  ;;  %v4328_v6 = vunpack.i.l.bf16 %v4327_v3  ;;  %v4334_v7 = vunpack.i.h.bf16 %v4332_v4  ;;  %v4333_v8 = vunpack.i.l.bf16 %v4332_v4 }
  0xe8   :  { %2747 = vst.msk [vmem:[#allocation0 + $0x40] sm:$0xff] %vm2724_vm5, %v4328_v6   ;;  %2758 = vst.msk [vmem:[#allocation0 + $0x60] sm:$0xff] %vm2724_vm5, %v4329_v5  }
  0xe9   :  { %2769 = vst.msk [vmem:[#allocation0 + $0x8] sm:$0xff] %vm2724_vm5, %v4333_v8   ;;  %2780 = vst.msk [vmem:[#allocation0 + $0x28] sm:$0xff] %vm2724_vm5, %v4334_v7   ;;  %v4337_v9 = vpop.permute.xlu1 %4336  ;;  %v4342_v10 = vpop.permute.xlu0 %4341 }
  0xea   :  { %v4339_v11 = vunpack.i.h.bf16 %v4337_v9  ;;  %v4338_v12 = vunpack.i.l.bf16 %v4337_v9  ;;  %v4344_v13 = vunpack.i.h.bf16 %v4342_v10  ;;  %v4343_v14 = vunpack.i.l.bf16 %v4342_v10 }
  0xec   :  { %2791 = vst.msk [vmem:[#allocation0 + $0x48] sm:$0xff] %vm2724_vm5, %v4338_v12   ;;  %2802 = vst.msk [vmem:[#allocation0 + $0x68] sm:$0xff] %vm2724_vm5, %v4339_v11  }
  0xed   :  { %2813 = vst.msk [vmem:[#allocation0 + $0x10] sm:$0xff] %vm2724_vm5, %v4343_v14   ;;  %2824 = vst.msk [vmem:[#allocation0 + $0x30] sm:$0xff] %vm2724_vm5, %v4344_v13   ;;  %v4347_v15 = vpop.permute.xlu1 %4346 }
  0xee   :  { %v4352_v16 = vpop.permute.xlu0 %4351  ;;  %v4349_v17 = vunpack.i.h.bf16 %v4347_v15  ;;  %v4348_v18 = vunpack.i.l.bf16 %v4347_v15 }
  0xef   :  { %v4354_v19 = vunpack.i.h.bf16 %v4352_v16  ;;  %v4353_v20 = vunpack.i.l.bf16 %v4352_v16 }
  0xf0   :  { %2835 = vst.msk [vmem:[#allocation0 + $0x50] sm:$0xff] %vm2724_vm5, %v4348_v18   ;;  %2846 = vst.msk [vmem:[#allocation0 + $0x70] sm:$0xff] %vm2724_vm5, %v4349_v17  }
  0xf1   :  { %2857 = vst.msk [vmem:[#allocation0 + $0x18] sm:$0xff] %vm2724_vm5, %v4353_v20   ;;  %2868 = vst.msk [vmem:[#allocation0 + $0x38] sm:$0xff] %vm2724_vm5, %v4354_v19  }
  0xf2   :  { %v4357_v21 = vpop.permute.xlu1 %4356  ;;  %v4362_v22 = vpop.permute.xlu0 %4361 }
  0xf3   :  { %v4359_v23 = vunpack.i.h.bf16 %v4357_v21  ;;  %v4358_v24 = vunpack.i.l.bf16 %v4357_v21  ;;  %v4364_v25 = vunpack.i.h.bf16 %v4362_v22  ;;  %v4363_v26 = vunpack.i.l.bf16 %v4362_v22 }
  0xf5   :  { %2879 = vst.msk [vmem:[#allocation0 + $0x58] sm:$0xff] %vm2724_vm5, %v4358_v24   ;;  %2890 = vst.msk [vmem:[#allocation0 + $0x78] sm:$0xff] %vm2724_vm5, %v4359_v23  }
  0xf6   :  { %2900 = vst.msk [vmem:[#allocation0] sm:$0xff] %vm2899_vm6, %v4363_v26   ;;  %2911 = vst.msk [vmem:[#allocation0 + $0x20] sm:$0xff] %vm2899_vm6, %v4364_v25   ;;  %v4367_v27 = vpop.permute.xlu1 %4366  ;;  %v4372_v28 = vpop.permute.xlu0 %4371 }
  0xf7   :  { %v4369_v29 = vunpack.i.h.bf16 %v4367_v27  ;;  %v4368_v30 = vunpack.i.l.bf16 %v4367_v27  ;;  %v4374_v31 = vunpack.i.h.bf16 %v4372_v28  ;;  %v4373_v32 = vunpack.i.l.bf16 %v4372_v28 }
  0xf9   :  { %2922 = vst.msk [vmem:[#allocation0 + $0x40] sm:$0xff] %vm2899_vm6, %v4368_v30   ;;  %2933 = vst.msk [vmem:[#allocation0 + $0x60] sm:$0xff] %vm2899_vm6, %v4369_v29  }
  0xfa   :  { %2944 = vst.msk [vmem:[#allocation0 + $0x8] sm:$0xff] %vm2899_vm6, %v4373_v32   ;;  %2955 = vst.msk [vmem:[#allocation0 + $0x28] sm:$0xff] %vm2899_vm6, %v4374_v31   ;;  %v4377_v33 = vpop.permute.xlu1 %4376  ;;  %v4382_v34 = vpop.permute.xlu0 %4381 }
  0xfb   :  { %v4379_v35 = vunpack.i.h.bf16 %v4377_v33  ;;  %v4378_v36 = vunpack.i.l.bf16 %v4377_v33  ;;  %v4384_v37 = vunpack.i.h.bf16 %v4382_v34  ;;  %v4383_v38 = vunpack.i.l.bf16 %v4382_v34 }
  0xfd   :  { %2966 = vst.msk [vmem:[#allocation0 + $0x48] sm:$0xff] %vm2899_vm6, %v4378_v36   ;;  %2977 = vst.msk [vmem:[#allocation0 + $0x68] sm:$0xff] %vm2899_vm6, %v4379_v35  }
  0xfe   :  { %2988 = vst.msk [vmem:[#allocation0 + $0x10] sm:$0xff] %vm2899_vm6, %v4383_v38   ;;  %2999 = vst.msk [vmem:[#allocation0 + $0x30] sm:$0xff] %vm2899_vm6, %v4384_v37   ;;  %v4387_v39 = vpop.permute.xlu1 %4386  ;;  %v4392_v40 = vpop.permute.xlu0 %4391 }
  0xff   :  { %v4389_v41 = vunpack.i.h.bf16 %v4387_v39  ;;  %v4388_v42 = vunpack.i.l.bf16 %v4387_v39  ;;  %v4394_v43 = vunpack.i.h.bf16 %v4392_v40  ;;  %v4393_v44 = vunpack.i.l.bf16 %v4392_v40 }
 0x101   :  { %3010 = vst.msk [vmem:[#allocation0 + $0x50] sm:$0xff] %vm2899_vm6, %v4388_v42   ;;  %3021 = vst.msk [vmem:[#allocation0 + $0x70] sm:$0xff] %vm2899_vm6, %v4389_v41  }
 0x102   :  { %3032 = vst.msk [vmem:[#allocation0 + $0x18] sm:$0xff] %vm2899_vm6, %v4393_v44   ;;  %3043 = vst.msk [vmem:[#allocation0 + $0x38] sm:$0xff] %vm2899_vm6, %v4394_v43   ;;  %v4397_v45 = vpop.permute.xlu1 %4396  ;;  %v4402_v46 = vpop.permute.xlu0 %4401 }
 0x103   :  { %v4399_v47 = vunpack.i.h.bf16 %v4397_v45  ;;  %v4398_v48 = vunpack.i.l.bf16 %v4397_v45  ;;  %v4404_v49 = vunpack.i.h.bf16 %v4402_v46  ;;  %v4403_v50 = vunpack.i.l.bf16 %v4402_v46 }
 0x105   :  { %3054 = vst.msk [vmem:[#allocation0 + $0x58] sm:$0xff] %vm2899_vm6, %v4398_v48   ;;  %3065 = vst.msk [vmem:[#allocation0 + $0x78] sm:$0xff] %vm2899_vm6, %v4399_v47  }
 0x106   :  { %3075 = vst.msk [vmem:[#allocation0] sm:$0xff] %vm3074_vm7, %v4403_v50   ;;  %3086 = vst.msk [vmem:[#allocation0 + $0x20] sm:$0xff] %vm3074_vm7, %v4404_v49   ;;  %v4407_v51 = vpop.permute.xlu1 %4406  ;;  %v4412_v52 = vpop.permute.xlu0 %4411 }
 0x107   :  { %v4409_v53 = vunpack.i.h.bf16 %v4407_v51  ;;  %v4408_v54 = vunpack.i.l.bf16 %v4407_v51  ;;  %v4414_v55 = vunpack.i.h.bf16 %v4412_v52  ;;  %v4413_v56 = vunpack.i.l.bf16 %v4412_v52 }
 0x109   :  { %3097 = vst.msk [vmem:[#allocation0 + $0x40] sm:$0xff] %vm3074_vm7, %v4408_v54   ;;  %3108 = vst.msk [vmem:[#allocation0 + $0x60] sm:$0xff] %vm3074_vm7, %v4409_v53  }
 0x10a   :  { %3119 = vst.msk [vmem:[#allocation0 + $0x8] sm:$0xff] %vm3074_vm7, %v4413_v56   ;;  %3130 = vst.msk [vmem:[#allocation0 + $0x28] sm:$0xff] %vm3074_vm7, %v4414_v55   ;;  %v4417_v57 = vpop.permute.xlu1 %4416  ;;  %v4422_v58 = vpop.permute.xlu0 %4421 }
 0x10b   :  { %v4419_v59 = vunpack.i.h.bf16 %v4417_v57  ;;  %v4418_v60 = vunpack.i.l.bf16 %v4417_v57  ;;  %v4424_v61 = vunpack.i.h.bf16 %v4422_v58  ;;  %v4423_v62 = vunpack.i.l.bf16 %v4422_v58 }
 0x10d   :  { %3141 = vst.msk [vmem:[#allocation0 + $0x48] sm:$0xff] %vm3074_vm7, %v4418_v60   ;;  %3152 = vst.msk [vmem:[#allocation0 + $0x68] sm:$0xff] %vm3074_vm7, %v4419_v59  }
 0x10e   :  { %3163 = vst.msk [vmem:[#allocation0 + $0x10] sm:$0xff] %vm3074_vm7, %v4423_v62   ;;  %3174 = vst.msk [vmem:[#allocation0 + $0x30] sm:$0xff] %vm3074_vm7, %v4424_v61   ;;  %v4427_v63 = vpop.permute.xlu1 %4426  ;;  %v4432_v0 = vpop.permute.xlu0 %4431 }
 0x10f   :  { %v4429_v1 = vunpack.i.h.bf16 %v4427_v63  ;;  %v4428_v2 = vunpack.i.l.bf16 %v4427_v63  ;;  %v4434_v3 = vunpack.i.h.bf16 %v4432_v0  ;;  %v4433_v4 = vunpack.i.l.bf16 %v4432_v0 }
 0x111   :  { %3185 = vst.msk [vmem:[#allocation0 + $0x50] sm:$0xff] %vm3074_vm7, %v4428_v2   ;;  %3196 = vst.msk [vmem:[#allocation0 + $0x70] sm:$0xff] %vm3074_vm7, %v4429_v1  }
 0x112   :  { %3207 = vst.msk [vmem:[#allocation0 + $0x18] sm:$0xff] %vm3074_vm7, %v4433_v4   ;;  %3218 = vst.msk [vmem:[#allocation0 + $0x38] sm:$0xff] %vm3074_vm7, %v4434_v3   ;;  %v4437_v5 = vpop.permute.xlu1 %4436  ;;  %v4442_v6 = vpop.permute.xlu0 %4441 }
 0x113   :  { %v4439_v7 = vunpack.i.h.bf16 %v4437_v5  ;;  %v4438_v8 = vunpack.i.l.bf16 %v4437_v5  ;;  %v4444_v9 = vunpack.i.h.bf16 %v4442_v6  ;;  %v4443_v10 = vunpack.i.l.bf16 %v4442_v6 }
 0x115   :  { %3229 = vst.msk [vmem:[#allocation0 + $0x58] sm:$0xff] %vm3074_vm7, %v4438_v8   ;;  %3240 = vst.msk [vmem:[#allocation0 + $0x78] sm:$0xff] %vm3074_vm7, %v4439_v7  }
 0x116   :  { %3250 = vst.msk [vmem:[#allocation0] sm:$0xff] %vm3249_vm8, %v4443_v10   ;;  %3261 = vst.msk [vmem:[#allocation0 + $0x20] sm:$0xff] %vm3249_vm8, %v4444_v9   ;;  %v4447_v11 = vpop.permute.xlu1 %4446  ;;  %v4452_v12 = vpop.permute.xlu0 %4451 }
 0x117   :  { %v4449_v13 = vunpack.i.h.bf16 %v4447_v11  ;;  %v4448_v14 = vunpack.i.l.bf16 %v4447_v11  ;;  %v4454_v15 = vunpack.i.h.bf16 %v4452_v12  ;;  %v4453_v16 = vunpack.i.l.bf16 %v4452_v12 }
 0x119   :  { %3272 = vst.msk [vmem:[#allocation0 + $0x40] sm:$0xff] %vm3249_vm8, %v4448_v14   ;;  %3283 = vst.msk [vmem:[#allocation0 + $0x60] sm:$0xff] %vm3249_vm8, %v4449_v13  }
 0x11a   :  { %3294 = vst.msk [vmem:[#allocation0 + $0x8] sm:$0xff] %vm3249_vm8, %v4453_v16   ;;  %3305 = vst.msk [vmem:[#allocation0 + $0x28] sm:$0xff] %vm3249_vm8, %v4454_v15   ;;  %v4457_v17 = vpop.permute.xlu1 %4456  ;;  %v4462_v18 = vpop.permute.xlu0 %4461 }
 0x11b   :  { %v4459_v19 = vunpack.i.h.bf16 %v4457_v17  ;;  %v4458_v20 = vunpack.i.l.bf16 %v4457_v17  ;;  %v4464_v21 = vunpack.i.h.bf16 %v4462_v18  ;;  %v4463_v22 = vunpack.i.l.bf16 %v4462_v18 }
 0x11d   :  { %3316 = vst.msk [vmem:[#allocation0 + $0x48] sm:$0xff] %vm3249_vm8, %v4458_v20   ;;  %3327 = vst.msk [vmem:[#allocation0 + $0x68] sm:$0xff] %vm3249_vm8, %v4459_v19   ;;  %v3421_v29 = vld [vmem:[#allocation0] sm:$0xff] }
 0x11e   :  { %3338 = vst.msk [vmem:[#allocation0 + $0x10] sm:$0xff] %vm3249_vm8, %v4463_v22   ;;  %3349 = vst.msk [vmem:[#allocation0 + $0x30] sm:$0xff] %vm3249_vm8, %v4464_v21   ;;  %v4467_v23 = vpop.permute.xlu1 %4466  ;;  %v4472_v24 = vpop.permute.xlu0 %4471  ;;  %v3450_v31 = vld [vmem:[#allocation0 + $0x20] sm:$0xff] }
 0x11f   :  { %v4469_v25 = vunpack.i.h.bf16 %v4467_v23  ;;  %v4468_v26 = vunpack.i.l.bf16 %v4467_v23  ;;  %v4474_v27 = vunpack.i.h.bf16 %v4472_v24  ;;  %v4473_v28 = vunpack.i.l.bf16 %v4472_v24 }
 0x120   :  { %v3482_v36 = vld [vmem:[#allocation0 + $0x40] sm:$0xff] }
 0x121   :  { %v3427_v30 = vld [vmem:[#allocation0 + $0x8] sm:$0xff]  ;;  %3360 = vst.msk [vmem:[#allocation0 + $0x50] sm:$0xff] %vm3249_vm8, %v4468_v26   ;;  %3371 = vst.msk [vmem:[#allocation0 + $0x70] sm:$0xff] %vm3249_vm8, %v4469_v25   ;;  %v3514_v39 = vld [vmem:[#allocation0 + $0x60] sm:$0xff] }
 0x122   :  { %v3458_v32 = vld [vmem:[#allocation0 + $0x28] sm:$0xff]  ;;  %v4086_v33 = vpack.c.bf16 %v3427_v30, %v3421_v29  ;;  %3382 = vst.msk [vmem:[#allocation0 + $0x18] sm:$0xff] %vm3249_vm8, %v4473_v28   ;;  %3393 = vst.msk [vmem:[#allocation0 + $0x38] sm:$0xff] %vm3249_vm8, %v4474_v27   ;;  %v4477_v35 = vpop.permute.xlu1 %4476 }
 0x123   :  { %v4096_v34 = vpack.c.bf16 %v3458_v32, %v3450_v31  ;;  %v4479_v37 = vunpack.i.h.bf16 %v4477_v35  ;;  %v4478_v38 = vunpack.i.l.bf16 %v4477_v35 }
 0x124   :  { %4087 = vst [vmem:[%s5026_s1] sm:$0xff] %v4086_v33   ;;  %v3490_v40 = vld [vmem:[#allocation0 + $0x48] sm:$0xff] }
 0x125   :  { %v3522_v41 = vld [vmem:[#allocation0 + $0x68] sm:$0xff]  ;;  %4187 = vst [vmem:[%s5026_s1 + $0x10] sm:$0xff] %v4096_v34   ;;  %v4106_v42 = vpack.c.bf16 %v3490_v40, %v3482_v36  ;;  %3404 = vst.msk [vmem:[#allocation0 + $0x58] sm:$0xff] %vm3249_vm8, %v4478_v38   ;;  %v3434_v44 = vld [vmem:[#allocation0 + $0x10] sm:$0xff] }
 0x126   :  { %v4116_v43 = vpack.c.bf16 %v3522_v41, %v3514_v39  ;;  %3415 = vst.msk [vmem:[#allocation0 + $0x78] sm:$0xff] %vm3249_vm8, %v4479_v37   ;;  %v3466_v46 = vld [vmem:[#allocation0 + $0x30] sm:$0xff] }
 0x127   :  { %4189 = vst [vmem:[%s5026_s1 + $0x20] sm:$0xff] %v4106_v42  }
 0x128   :  { %4191 = vst [vmem:[%s5026_s1 + $0x30] sm:$0xff] %v4116_v43   ;;  %v3498_v50 = vld [vmem:[#allocation0 + $0x50] sm:$0xff] }
 0x129   :  { %v3442_v45 = vld [vmem:[#allocation0 + $0x18] sm:$0xff]  ;;  %v3530_v51 = vld [vmem:[#allocation0 + $0x70] sm:$0xff] }
 0x12a   :  { %v4091_v47 = vpack.c.bf16 %v3442_v45, %v3434_v44  ;;  %v3474_v48 = vld [vmem:[#allocation0 + $0x38] sm:$0xff] }
 0x12b   :  { %v4101_v49 = vpack.c.bf16 %v3474_v48, %v3466_v46 }
 0x12c   :  { %4186 = vst [vmem:[%s5026_s1 + $0x8] sm:$0xff] %v4091_v47   ;;  %v3506_v52 = vld [vmem:[#allocation0 + $0x58] sm:$0xff] }
 0x12d   :  { %4188 = vst [vmem:[%s5026_s1 + $0x18] sm:$0xff] %v4101_v49   ;;  %v3538_v53 = vld [vmem:[#allocation0 + $0x78] sm:$0xff]  ;;  %v4111_v54 = vpack.c.bf16 %v3506_v52, %v3498_v50 }
 0x12e   :  { %v4121_v55 = vpack.c.bf16 %v3538_v53, %v3530_v51 }
 0x12f   :  { %4190 = vst [vmem:[%s5026_s1 + $0x28] sm:$0xff] %v4111_v54  }
 0x130   :  { %4192 = vst [vmem:[%s5026_s1 + $0x38] sm:$0xff] %v4121_v55  }

// kernel: tile.13
= control target key start
LH: loop header
LB: loop body
LE: loop exit
PB: predicated region body
PF: predicated region fallthrough
CT: control target
= control target key end

     0   :  { %s40_s0 = inlined_call_operand.vmem [shape: f32[8], index: 0, kind: input, shape index: {}]   ;;  %s41_s1 = inlined_call_operand.vmem [shape: f32[32,8], index: 1, kind: output, shape index: {}]  }
   0x1   :  { %v4_v0 = vld [vmem:[%s40_s0] ss:$0 sm:$0xff] }
   0x2   :  { %5 = vst [vmem:[%s41_s1] sm:$0xff] %v4_v0  ;;  %12 = vst [vmem:[%s41_s1 + $0x8] sm:$0xff] %v4_v0 }
   0x3   :  { %13 = vst [vmem:[%s41_s1 + $0x10] sm:$0xff] %v4_v0  ;;  %14 = vst [vmem:[%s41_s1 + $0x18] sm:$0xff] %v4_v0 }

// kernel: tile.14
= control target key start
LH: loop header
LB: loop body
LE: loop exit
PB: predicated region body
PF: predicated region fallthrough
CT: control target
= control target key end

     0   :  { %s7_s6 = smov 3  ;;  %s21_s9 = smov 3  ;;  %vm4_vm0 = vcmask 64512   ;;  %vm11_vm1 = vcmask 1048512   ;;  %vm18_vm2 = vcmask 982912   ;;  %vm25_vm3 = vcmask 917312   ;;  %s235_s0 = inlined_call_operand.vmem [shape: f32[32,8], index: 0, kind: input, shape index: {}]   ;;  %s236_s1 = inlined_call_operand.vmem [shape: f32[1,256], index: 1, kind: output, shape index: {}]  }
   0x1   :  { %v125_v0 = vld [vmem:[%s235_s0 + $0xf] ss:$16 sm:%s7_s6]   ;;  %s156_s10 = smov 120   ;;  %v127_v1 = vld [vmem:[%s235_s0 + $0xd] ss:$16 sm:%s21_s9]   ;;  %s14_s13 = smov 3 }
   0x2   :  { %9 = vrot.lane.b32.xlu0 %v125_v0, %s156_s10  ;;  %s157_s14 = smov 104   ;;  %v126_v2 = vld [vmem:[%s235_s0 + $0xe] ss:$16 sm:%s14_s13]   ;;  %s28_s17 = smov 3  ;;  %vm32_vm4 = vcmask 851712   ;;  %vm39_vm5 = vcmask 786112  }
   0x3   :  { %23 = vrot.lane.b32.xlu1 %v127_v1, %s157_s14  ;;  %v128_v3 = vld [vmem:[%s235_s0 + $0xc] ss:$16 sm:%s28_s17]   ;;  %s35_s20 = smov 3  ;;  %s42_s21 = smov 3  ;;  %vm46_vm6 = vcmask 720512   ;;  %vm53_vm7 = vcmask 654912  }
   0x4   :  { %s158_s22 = smov 112   ;;  %s159_s23 = smov 96   ;;  %v129_v4 = vld [vmem:[%s235_s0 + $0xb] ss:$16 sm:%s35_s20]   ;;  %v130_v5 = vld [vmem:[%s235_s0 + $0xa] ss:$16 sm:%s42_s21]  }
   0x5   :  { %s49_s28 = smov 3  ;;  %s56_s29 = smov 3  ;;  %vm60_vm8 = vcmask 589312   ;;  %vm67_vm9 = vcmask 523712   ;;  %vm74_vm10 = vcmask 458112   ;;  %vm81_vm11 = vcmask 392512  }
   0x6   :  { %16 = vrot.lane.b32.xlu0 %v126_v2, %s158_s22  ;;  %s160_s30 = smov 88   ;;  %s161_s2 = smov 80   ;;  %v131_v6 = vld [vmem:[%s235_s0 + $0x9] ss:$16 sm:%s49_s28]   ;;  %vm88_vm12 = vcmask 326912   ;;  %vm95_vm13 = vcmask 261312  }
   0x7   :  { %30 = vrot.lane.b32.xlu1 %v128_v3, %s159_s23  ;;  %v132_v7 = vld [vmem:[%s235_s0 + $0x8] ss:$16 sm:%s56_s29]   ;;  %s63_s7 = smov 3  ;;  %s70_s8 = smov 3  ;;  %vm102_vm14 = vcmask 195712   ;;  %vm109_vm15 = vcmask 130112  }
   0x8   :  { %s162_s9 = smov 72   ;;  %s163_s10 = smov 64   ;;  %v133_v8 = vld [vmem:[%s235_s0 + $0x7] ss:$16 sm:%s63_s7]   ;;  %v134_v9 = vld [vmem:[%s235_s0 + $0x6] ss:$16 sm:%s70_s8]  }
   0x9   :  { %s2_s13 = smov 3  ;;  %s77_s16 = smov 3 }
   0xa   :  { %37 = vrot.lane.b32.xlu0 %v129_v4, %s160_s30  ;;  %v3_v10 = vld [vmem:[%s235_s0] ss:$16 sm:%s2_s13]   ;;  %s84_s19 = smov 3  ;;  %s164_s20 = smov 56  }
   0xb   :  { %44 = vrot.lane.b32.xlu1 %v130_v5, %s161_s2  ;;  %5 = vst.msk [vmem:[#allocation0] ss:$8 sm:$0x3] %vm4_vm0, %v3_v10   ;;  %s165_s21 = smov 48   ;;  %v135_v11 = vld [vmem:[%s235_s0 + $0x5] ss:$16 sm:%s77_s16]  }
   0xc   :  { %v136_v12 = vld [vmem:[%s235_s0 + $0x4] ss:$16 sm:%s84_s19]   ;;  %s91_s26 = smov 3  ;;  %s98_s27 = smov 3 }
   0xd   :  { %s166_s28 = smov 40   ;;  %s167_s29 = smov 32   ;;  %v137_v13 = vld [vmem:[%s235_s0 + $0x3] ss:$16 sm:%s91_s26]   ;;  %v138_v14 = vld [vmem:[%s235_s0 + $0x2] ss:$16 sm:%s98_s27]  }
   0xe   :  { %51 = vrot.lane.b32.xlu0 %v131_v6, %s162_s9  ;;  %s105_s5 = smov 3  ;;  %s168_s6 = smov 24  }
   0xf   :  { %58 = vrot.lane.b32.xlu1 %v132_v7, %s163_s10  ;;  %s169_s7 = smov 16   ;;  %v139_v15 = vld [vmem:[%s235_s0 + $0x1] ss:$16 sm:%s105_s5]   ;;  %s170_s0 = smov 8  }
  0x12   :  { %65 = vrot.lane.b32.xlu0 %v133_v8, %s164_s20 }
  0x13   :  { %72 = vrot.lane.b32.xlu1 %v134_v9, %s165_s21 }
  0x16   :  { %79 = vrot.lane.b32.xlu0 %v135_v11, %s166_s28 }
  0x17   :  { %86 = vrot.lane.b32.xlu1 %v136_v12, %s167_s29 }
  0x1a   :  { %93 = vrot.lane.b32.xlu0 %v137_v13, %s168_s6 }
  0x1b   :  { %100 = vrot.lane.b32.xlu1 %v138_v14, %s169_s7 }
  0x1e   :  { %107 = vrot.lane.b32.xlu0 %v139_v15, %s170_s0 }
  0x74   :  { %v10_v16 = vpop.permute.xlu0 %9  }
  0x75   :  { %12 = vst.msk [vmem:[#allocation0] ss:$8 sm:$0x3] %vm11_vm1, %v10_v16   ;;  %v24_v17 = vpop.permute.xlu1 %23  }
  0x78   :  { %v17_v18 = vpop.permute.xlu0 %16  }
  0x79   :  { %19 = vst.msk [vmem:[#allocation0] ss:$8 sm:$0x3] %vm18_vm2, %v17_v18   ;;  %v31_v19 = vpop.permute.xlu1 %30  }
  0x7a   :  { %26 = vst.msk [vmem:[#allocation0] ss:$8 sm:$0x3] %vm25_vm3, %v24_v17  }
  0x7b   :  { %33 = vst.msk [vmem:[#allocation0] ss:$8 sm:$0x3] %vm32_vm4, %v31_v19  }
  0x7c   :  { %v38_v20 = vpop.permute.xlu0 %37  }
  0x7d   :  { %40 = vst.msk [vmem:[#allocation0] ss:$8 sm:$0x3] %vm39_vm5, %v38_v20   ;;  %v45_v21 = vpop.permute.xlu1 %44  }
  0x7e   :  { %47 = vst.msk [vmem:[#allocation0] ss:$8 sm:$0x3] %vm46_vm6, %v45_v21  }
  0x80   :  { %v52_v22 = vpop.permute.xlu0 %51  }
  0x81   :  { %54 = vst.msk [vmem:[#allocation0] ss:$8 sm:$0x3] %vm53_vm7, %v52_v22   ;;  %v59_v23 = vpop.permute.xlu1 %58  }
  0x82   :  { %61 = vst.msk [vmem:[#allocation0] ss:$8 sm:$0x3] %vm60_vm8, %v59_v23  }
  0x84   :  { %v66_v24 = vpop.permute.xlu0 %65  }
  0x85   :  { %68 = vst.msk [vmem:[#allocation0] ss:$8 sm:$0x3] %vm67_vm9, %v66_v24   ;;  %v73_v25 = vpop.permute.xlu1 %72  }
  0x86   :  { %75 = vst.msk [vmem:[#allocation0] ss:$8 sm:$0x3] %vm74_vm10, %v73_v25  }
  0x88   :  { %v80_v26 = vpop.permute.xlu0 %79  }
  0x89   :  { %82 = vst.msk [vmem:[#allocation0] ss:$8 sm:$0x3] %vm81_vm11, %v80_v26   ;;  %v87_v27 = vpop.permute.xlu1 %86  }
  0x8a   :  { %89 = vst.msk [vmem:[#allocation0] ss:$8 sm:$0x3] %vm88_vm12, %v87_v27  }
  0x8c   :  { %v94_v28 = vpop.permute.xlu0 %93  }
  0x8d   :  { %96 = vst.msk [vmem:[#allocation0] ss:$8 sm:$0x3] %vm95_vm13, %v94_v28   ;;  %v101_v29 = vpop.permute.xlu1 %100  }
  0x8e   :  { %103 = vst.msk [vmem:[#allocation0] ss:$8 sm:$0x3] %vm102_vm14, %v101_v29  }
  0x90   :  { %v108_v30 = vpop.permute.xlu0 %107  }
  0x91   :  { %110 = vst.msk [vmem:[#allocation0] ss:$8 sm:$0x3] %vm109_vm15, %v108_v30  }
  0x98   :  { %v115_v31 = vld [vmem:[#allocation0] sm:$0x1]  ;;  %v120_v32 = vld [vmem:[#allocation0 + $0x8] sm:$0x1] }
  0x99   :  { %118 = vst [vmem:[%s236_s1] sm:$0x1] %v115_v31  ;;  %140 = vst [vmem:[%s236_s1 + $0x1] sm:$0x1] %v120_v32 }

// kernel: tile.18
= control target key start
LH: loop header
LB: loop body
LE: loop exit
PB: predicated region body
PF: predicated region fallthrough
CT: control target
= control target key end

     0   :  { %s28_s0 = inlined_call_operand.vmem [shape: f32[8], index: 0, kind: input, shape index: {}]   ;;  %s29_s1 = inlined_call_operand.vmem [shape: f32[16,8], index: 1, kind: output, shape index: {}]  }
   0x1   :  { %v4_v0 = vld [vmem:[%s28_s0] ss:$0 sm:$0xff] }
   0x2   :  { %5 = vst [vmem:[%s29_s1] sm:$0xff] %v4_v0  ;;  %8 = vst [vmem:[%s29_s1 + $0x8] sm:$0xff] %v4_v0 }

// kernel: tile.19
= control target key start
LH: loop header
LB: loop body
LE: loop exit
PB: predicated region body
PF: predicated region fallthrough
CT: control target
= control target key end

     0   :  { %s133_s10 = smov 120   ;;  %s134_s11 = smov 104   ;;  %vm3_vm0 = vcmask 64512   ;;  %vm9_vm1 = vcmask 1048512   ;;  %vm15_vm2 = vcmask 982912   ;;  %vm21_vm3 = vcmask 917312   ;;  %s209_s0 = inlined_call_operand.vmem [shape: f32[16,8], index: 0, kind: input, shape index: {}]   ;;  %s210_s1 = inlined_call_operand.vmem [shape: f32[1,128], index: 1, kind: output, shape index: {}]  }
   0x1   :  { %v103_v0 = vld [vmem:[%s209_s0 + $0xf] sm:$0x1]   ;;  %v105_v1 = vld [vmem:[%s209_s0 + $0xd] sm:$0x1]   ;;  %v104_v2 = vld [vmem:[%s209_s0 + $0xe] sm:$0x1]  }
   0x2   :  { %7 = vrot.lane.b32.xlu0 %v103_v0, %s133_s10  ;;  %19 = vrot.lane.b32.xlu1 %v105_v1, %s134_s11  ;;  %v106_v3 = vld [vmem:[%s209_s0 + $0xc] sm:$0x1]   ;;  %s135_s16 = smov 112   ;;  %s136_s17 = smov 96   ;;  %v107_v4 = vld [vmem:[%s209_s0 + $0xb] sm:$0x1]  }
   0x3   :  { %v108_v5 = vld [vmem:[%s209_s0 + $0xa] sm:$0x1]   ;;  %v2_v6 = vld [vmem:[%s209_s0] sm:$0x1]   ;;  %s137_s24 = smov 88   ;;  %s138_s25 = smov 80  }
   0x4   :  { %4 = vst.msk [vmem:[#allocation0] sm:$0x1] %vm3_vm0, %v2_v6   ;;  %v109_v7 = vld [vmem:[%s209_s0 + $0x9] sm:$0x1]   ;;  %v110_v8 = vld [vmem:[%s209_s0 + $0x8] sm:$0x1]  }
   0x5   :  { %s139_s30 = smov 72   ;;  %s140_s2 = smov 64   ;;  %v111_v9 = vld [vmem:[%s209_s0 + $0x7] sm:$0x1]   ;;  %v112_v10 = vld [vmem:[%s209_s0 + $0x6] sm:$0x1]  }
   0x6   :  { %13 = vrot.lane.b32.xlu0 %v104_v2, %s135_s16  ;;  %25 = vrot.lane.b32.xlu1 %v106_v3, %s136_s17  ;;  %s141_s7 = smov 56   ;;  %s142_s8 = smov 48   ;;  %v113_v11 = vld [vmem:[%s209_s0 + $0x5] sm:$0x1]   ;;  %v114_v12 = vld [vmem:[%s209_s0 + $0x4] sm:$0x1]  }
   0x7   :  { %s143_s13 = smov 40   ;;  %s144_s14 = smov 32   ;;  %v115_v13 = vld [vmem:[%s209_s0 + $0x3] sm:$0x1]   ;;  %v116_v14 = vld [vmem:[%s209_s0 + $0x2] sm:$0x1]  }
   0x8   :  { %s145_s19 = smov 24   ;;  %s146_s20 = smov 16   ;;  %v117_v15 = vld [vmem:[%s209_s0 + $0x1] sm:$0x1]   ;;  %vm27_vm4 = vcmask 851712   ;;  %vm33_vm5 = vcmask 786112  }
   0x9   :  { %s147_s0 = smov 8   ;;  %vm39_vm6 = vcmask 720512   ;;  %vm45_vm7 = vcmask 654912   ;;  %vm51_vm8 = vcmask 589312   ;;  %vm57_vm9 = vcmask 523712  }
   0xa   :  { %31 = vrot.lane.b32.xlu0 %v107_v4, %s137_s24  ;;  %37 = vrot.lane.b32.xlu1 %v108_v5, %s138_s25  ;;  %vm63_vm10 = vcmask 458112   ;;  %vm69_vm11 = vcmask 392512   ;;  %vm75_vm12 = vcmask 326912   ;;  %vm81_vm13 = vcmask 261312  }
   0xb   :  { %vm87_vm14 = vcmask 195712   ;;  %vm93_vm15 = vcmask 130112  }
   0xe   :  { %43 = vrot.lane.b32.xlu0 %v109_v7, %s139_s30  ;;  %49 = vrot.lane.b32.xlu1 %v110_v8, %s140_s2 }
  0x12   :  { %55 = vrot.lane.b32.xlu0 %v111_v9, %s141_s7  ;;  %61 = vrot.lane.b32.xlu1 %v112_v10, %s142_s8 }
  0x16   :  { %67 = vrot.lane.b32.xlu0 %v113_v11, %s143_s13  ;;  %73 = vrot.lane.b32.xlu1 %v114_v12, %s144_s14 }
  0x1a   :  { %79 = vrot.lane.b32.xlu0 %v115_v13, %s145_s19  ;;  %85 = vrot.lane.b32.xlu1 %v116_v14, %s146_s20 }
  0x1e   :  { %91 = vrot.lane.b32.xlu0 %v117_v15, %s147_s0 }
  0x74   :  { %v8_v16 = vpop.permute.xlu0 %7   ;;  %v20_v17 = vpop.permute.xlu1 %19  }
  0x75   :  { %10 = vst.msk [vmem:[#allocation0] sm:$0x1] %vm9_vm1, %v8_v16  }
  0x78   :  { %v14_v18 = vpop.permute.xlu0 %13   ;;  %v26_v19 = vpop.permute.xlu1 %25  }
  0x79   :  { %16 = vst.msk [vmem:[#allocation0] sm:$0x1] %vm15_vm2, %v14_v18  }
  0x7a   :  { %22 = vst.msk [vmem:[#allocation0] sm:$0x1] %vm21_vm3, %v20_v17  }
  0x7b   :  { %28 = vst.msk [vmem:[#allocation0] sm:$0x1] %vm27_vm4, %v26_v19  }
  0x7c   :  { %v32_v20 = vpop.permute.xlu0 %31   ;;  %v38_v21 = vpop.permute.xlu1 %37  }
  0x7d   :  { %34 = vst.msk [vmem:[#allocation0] sm:$0x1] %vm33_vm5, %v32_v20  }
  0x7e   :  { %40 = vst.msk [vmem:[#allocation0] sm:$0x1] %vm39_vm6, %v38_v21  }
  0x80   :  { %v44_v22 = vpop.permute.xlu0 %43   ;;  %v50_v23 = vpop.permute.xlu1 %49  }
  0x81   :  { %46 = vst.msk [vmem:[#allocation0] sm:$0x1] %vm45_vm7, %v44_v22  }
  0x82   :  { %52 = vst.msk [vmem:[#allocation0] sm:$0x1] %vm51_vm8, %v50_v23  }
  0x84   :  { %v56_v24 = vpop.permute.xlu0 %55   ;;  %v62_v25 = vpop.permute.xlu1 %61  }
  0x85   :  { %58 = vst.msk [vmem:[#allocation0] sm:$0x1] %vm57_vm9, %v56_v24  }
  0x86   :  { %64 = vst.msk [vmem:[#allocation0] sm:$0x1] %vm63_vm10, %v62_v25  }
  0x88   :  { %v68_v26 = vpop.permute.xlu0 %67   ;;  %v74_v27 = vpop.permute.xlu1 %73  }
  0x89   :  { %70 = vst.msk [vmem:[#allocation0] sm:$0x1] %vm69_vm11, %v68_v26  }
  0x8a   :  { %76 = vst.msk [vmem:[#allocation0] sm:$0x1] %vm75_vm12, %v74_v27  }
  0x8c   :  { %v80_v28 = vpop.permute.xlu0 %79   ;;  %v86_v29 = vpop.permute.xlu1 %85  }
  0x8d   :  { %82 = vst.msk [vmem:[#allocation0] sm:$0x1] %vm81_vm13, %v80_v28  }
  0x8e   :  { %88 = vst.msk [vmem:[#allocation0] sm:$0x1] %vm87_vm14, %v86_v29  }
  0x90   :  { %v92_v30 = vpop.permute.xlu0 %91  }
  0x91   :  { %94 = vst.msk [vmem:[#allocation0] sm:$0x1] %vm93_vm15, %v92_v30  }
  0x98   :  { %v99_v31 = vld [vmem:[#allocation0] sm:$0x1] }
  0x99   :  { %102 = vst [vmem:[%s210_s1] sm:$0x1] %v99_v31 }

// kernel: decoder_forward.1
= control target key start
LH: loop header
LB: loop body
LE: loop exit
PB: predicated region body
PF: predicated region fallthrough
CT: control target
= control target key end

     0   :  { %s1264_s18 = smov 0   ;;  %s1545_s0 = inlined_call_operand.vmem [shape: f32[2,8,128], index: 0, kind: input, shape index: {}]   ;;  %s1546_s1 = inlined_call_operand.vmem [shape: bf16[128,256], index: 1, kind: input, shape index: {}]   ;;  %s1547_s2 = inlined_call_operand.vmem [shape: f32[1,256], index: 2, kind: input, shape index: {}]   ;;  %s1548_s3 = inlined_call_operand.vmem [shape: bf16[3,128,128], index: 3, kind: input, shape index: {}]   ;;  %s1549_s4 = inlined_call_operand.vmem [shape: f32[1,128], index: 4, kind: input, shape index: {}]   ;;  %s1550_s5 = inlined_call_operand.vmem [shape: f32[2,2,8,128], index: 5, kind: output, shape index: {}]  }
   0x1 LB: > { %s905_s19 = sadd.s32 4294967295, %s1229_s18   ;;  %p909_p0 = scmp.ge.s32.totalorder %s1229_s18, 1  ;;  %s1229_s18 = sphi %s1264_s18, %s15_s18  }
   0x2   : > { %p186_p1 = scmp.lt.s32.totalorder %s1229_s18, 3 }
   0x4   : > { %p187_p2 = pnand %p909_p0, %p186_p1 }
   0x5   : > { %p213_p3 = scmp.lt.s32.totalorder (!%p187_p2), %s905_s19, 1 }
   0x6   : > { %190 = sbr.rel (%p187_p2) target bundleno = 515 (0x203), region = 40 }
   0xb   : > { %v1175_v0 = vld [vmem:[%s1546_s1 + $0x74] ss:$8 sps:$4 sm:$0xff]   ;;  %v1177_v1 = vld [vmem:[%s1546_s1 + $0x70] ss:$8 sps:$4 sm:$0xff]   ;;  %v1231_v2 = vmov 0   ;;  %v1232_v4 = vmov 0.0   ;;  %v243_v36 = vlaneseq }
   0xc   : > { %365 = vmatprep.mubr.bf16.mxu0 %v1231_v2  ;;  %333 = vmatprep.subr.bf16.mxu0 %v1175_v0  ;;  %v1178_v3 = vld [vmem:[%s1546_s1 + $0x64] ss:$8 sps:$4 sm:$0xff]   ;;  %v1180_v5 = vld [vmem:[%s1546_s1 + $0x60] ss:$8 sps:$4 sm:$0xff]   ;;  %v1181_v6 = vld [vmem:[%s1546_s1 + $0x54] ss:$8 sps:$4 sm:$0xff]  }
   0xd   : > { %1044 = vmatprep.subr.bf16.mxu1 %v1232_v4  ;;  %334 = vmatpush1.bf16.msra.mxu0 %v1177_v1  ;;  %v1183_v7 = vld [vmem:[%s1546_s1 + $0x50] ss:$8 sps:$4 sm:$0xff]   ;;  %v1184_v8 = vld [vmem:[%s1546_s1 + $0x44] ss:$8 sps:$4 sm:$0xff]   ;;  %v1186_v9 = vld [vmem:[%s1546_s1 + $0x40] ss:$8 sps:$4 sm:$0xff]  }
   0xe   : > { %335 = vmatprep.subr.bf16.mxu0 %v1178_v3  ;;  %v1300_v10 = vld [vmem:[%s1548_s3 + $0x78] sm:$0xff]   ;;  %v1309_v12 = vld [vmem:[%s1548_s3 + $0x70] sm:$0xff]   ;;  %s1552_s19 = smov (!%p213_p3, %s905_s19), 1  ;;  %v1190_v14 = vld [vmem:[%s1546_s1 + $0x24] ss:$8 sps:$4 sm:$0xff]   ;;  %vm1233_vm0 = vmmov 0  }
   0xf   : > { %v1187_v11 = vld [vmem:[%s1546_s1 + $0x34] ss:$8 sps:$4 sm:$0xff]   ;;  %1045 = vmatpush3.bf16.msra.mxu1 %v1300_v10  ;;  %v1189_v13 = vld [vmem:[%s1546_s1 + $0x30] ss:$8 sps:$4 sm:$0xff]   ;;  %v1324_v15 = vld [vmem:[%s1548_s3 + $0x68] sm:$0xff]   ;;  %s910_s25 = sshll.u32 %s1552_s19, 3  ;;  %1060 = vmatprep.mubr.msk.bf16.mxu1 %vm1233_vm0, %v1232_v4 }
  0x10   : > { %1046 = vmatprep.subr.bf16.mxu1 %v1232_v4  ;;  %v1192_v16 = vld [vmem:[%s1546_s1 + $0x20] ss:$8 sps:$4 sm:$0xff]   ;;  %v1193_v17 = vld [vmem:[%s1546_s1 + $0x14] ss:$8 sps:$4 sm:$0xff]   ;;  %v1195_v18 = vld [vmem:[%s1546_s1 + $0x10] ss:$8 sps:$4 sm:$0xff]   ;;  %s216_s13 = scalar_lea.vmem %s1545_s0, %s910_s25 }
  0x11   : > { %336 = vmatpush1.bf16.msra.mxu0 %v1180_v5  ;;  %v1341_v19 = vld [vmem:[%s1548_s3 + $0x60] sm:$0xff]   ;;  %v1353_v21 = vld [vmem:[%s1548_s3 + $0x58] sm:$0xff]   ;;  %v1363_v24 = vld [vmem:[%s1548_s3 + $0x50] sm:$0xff]   ;;  %v244_v37 = vshrl.u32 %v243_v36, 7  ;;  %vm386_vm1 = vcmask 1040384   ;;  %vm398_vm4 = vcmask 1043456  }
  0x12   : > { %337 = vmatprep.subr.bf16.mxu0 %v1181_v6  ;;  %v1196_v20 = vld [vmem:[%s1546_s1 + $0x4] ss:$8 sps:$4 sm:$0xff]   ;;  %v1198_v22 = vld [vmem:[%s1546_s1] ss:$8 sps:$4 sm:$0xff]   ;;  %v1370_v26 = vld [vmem:[%s1548_s3 + $0x38] sm:$0xff]   ;;  %s989_s12 = sshll.u32 %s1552_s19, 4 }
  0x13   : > { %1047 = vmatpush3.bf16.msra.mxu1 %v1309_v12  ;;  %v223_v23 = vld [vmem:[%s216_s13] sm:$0xff]  ;;  %v1377_v27 = vld [vmem:[%s1548_s3 + $0x48] sm:$0xff]   ;;  %v1384_v28 = vld [vmem:[%s1548_s3 + $0x30] sm:$0xff]   ;;  %v245_v38 = vsub.s32 0, %v244_v37  ;;  %v249_v40 = vsub.s32 1, %v244_v37  ;;  %s221_s17 = scalar_lea.vmem %s1550_s5, %s989_s12 }
  0x14   : > { %1048 = vmatprep.subr.bf16.mxu1 %v1232_v4  ;;  %v224_v25 = vpack.c.bf16 %v223_v23, %v223_v23  ;;  %v1393_v29 = vld [vmem:[%s1548_s3 + $0x28] sm:$0xff]   ;;  %v1400_v30 = vld [vmem:[%s1548_s3 + $0x20] sm:$0xff]   ;;  %v1408_v31 = vld [vmem:[%s1548_s3 + $0x18] sm:$0xff]   ;;  %vm387_vm2 = vsmask.f32 256 }
  0x15   : > { %338 = vmatpush1.bf16.msra.mxu0 %v1183_v7  ;;  %v1414_v32 = vld [vmem:[%s1548_s3 + $0x40] sm:$0xff]   ;;  %v1420_v33 = vld [vmem:[%s1548_s3 + $0x10] sm:$0xff]   ;;  %v1433_v34 = vld [vmem:[%s1548_s3 + $0x8] sm:$0xff]   ;;  %vm399_vm5 = vsmask.f32 3328 }
  0x16   : > { %339 = vmatprep.subr.bf16.mxu0 %v1184_v8  ;;  %v1440_v35 = vld [vmem:[%s1548_s3] sm:$0xff]   ;;  %v1450_v49 = vld [vmem:[%s1548_s3 + $0xb8] sm:$0xff]   ;;  %v1215_v54 = vld [vmem:[%s1548_s3 + $0xb0] sm:$0xff]  }
  0x17   : > { %1049 = vmatpush3.bf16.msra.mxu1 %v1324_v15  ;;  %v241_v39 = vld [vmem:[%s1547_s2] sm:$0x3]  ;;  %v1217_v58 = vld [vmem:[%s1548_s3 + $0xa8] sm:$0xff]   ;;  %vm388_vm3 = vmand %vm386_vm1, %vm387_vm2 }
  0x18   : > { %1050 = vmatprep.subr.bf16.mxu1 %v1232_v4  ;;  %v246_v41 = vrot.slane %v241_v39, %v245_v38  ;;  %v250_v42 = vrot.slane %v241_v39, %v249_v40  ;;  %v1218_v61 = vld [vmem:[%s1548_s3 + $0xa0] sm:$0xff]   ;;  %v1219_v62 = vld [vmem:[%s1548_s3 + $0x98] sm:$0xff]   ;;  %v1220_v63 = vld [vmem:[%s1548_s3 + $0x90] sm:$0xff]  }
  0x19   : > { %340 = vmatpush1.bf16.msra.mxu0 %v1186_v9  ;;  %v1221_v0 = vld [vmem:[%s1548_s3 + $0x88] sm:$0xff]   ;;  %v1222_v1 = vld [vmem:[%s1548_s3 + $0x80] sm:$0xff]   ;;  %vm400_vm6 = vmand %vm398_vm4, %vm399_vm5 }
  0x1a   : > { %341 = vmatprep.subr.bf16.mxu0 %v1187_v11 }
  0x1b   : > { %1051 = vmatpush3.bf16.msra.mxu1 %v1341_v19 }
  0x1c   : > { %1052 = vmatprep.subr.bf16.mxu1 %v1232_v4 }
  0x1d   : > { %342 = vmatpush1.bf16.msra.mxu0 %v1189_v13 }
  0x1e   : > { %343 = vmatprep.subr.bf16.mxu0 %v1190_v14 }
  0x1f   : > { %1053 = vmatpush3.bf16.msra.mxu1 %v1353_v21 }
  0x20   : > { %1054 = vmatprep.subr.bf16.mxu1 %v1232_v4 }
  0x21   : > { %344 = vmatpush1.bf16.msra.mxu0 %v1192_v16 }
  0x22   : > { %345 = vmatprep.subr.bf16.mxu0 %v1193_v17  ;;  %v985_v17 = vld [vmem:[%s1549_s4] ss:$0 sm:$0xff] }
  0x23   : > { %1055 = vmatpush3.bf16.msra.mxu1 %v1363_v24 }
  0x24   : > { %1056 = vmatprep.subr.bf16.mxu1 %v1232_v4 }
  0x25   : > { %346 = vmatpush1.bf16.msra.mxu0 %v1195_v18 }
  0x26   : > { %347 = vmatprep.subr.bf16.mxu0 %v1196_v20 }
  0x27   : > { %1057 = vmatpush3.bf16.msra.mxu1 %v1377_v27 }
  0x28   : > { %1058 = vmatprep.subr.bf16.mxu1 %v1232_v4 }
  0x29   : > { %348 = vmatpush1.bf16.msra.mxu0 %v1198_v22 }
  0x2a   : > { %1064 = vmatprep.subr.bf16.mxu0 %v1232_v4 }
  0x2b   : > { %1059 = vmatpush3.bf16.msra.mxu1 %v1414_v32 }
  0x2c   : > { %366 = vmatmul.mubr.bf16.vlgmr.msra.gmra.mxu0 %v224_v25  ;;  %1084 = vmatprep.subr.bf16.mxu1 %v1232_v4 }
  0x2d   : > { %1065 = vmatpush3.bf16.msra.mxu0 %v1370_v26  ;;  %1080 = vmatprep.mubr.msk.bf16.mxu0 %vm1233_vm0, %v1232_v4 }
  0x2e   : > { %1066 = vmatprep.subr.bf16.mxu0 %v1232_v4 }
  0x31   : > { %1067 = vmatpush3.bf16.msra.mxu0 %v1384_v28 }
  0x32   : > { %1068 = vmatprep.subr.bf16.mxu0 %v1232_v4 }
  0x35   : > { %1069 = vmatpush3.bf16.msra.mxu0 %v1393_v29 }
  0x36   : > { %1070 = vmatprep.subr.bf16.mxu0 %v1232_v4 }
  0x39   : > { %1071 = vmatpush3.bf16.msra.mxu0 %v1400_v30 }
  0x3a   : > { %1072 = vmatprep.subr.bf16.mxu0 %v1232_v4 }
  0x3d   : > { %1073 = vmatpush3.bf16.msra.mxu0 %v1408_v31 }
  0x3e   : > { %1074 = vmatprep.subr.bf16.mxu0 %v1232_v4 }
  0x41   : > { %1075 = vmatpush3.bf16.msra.mxu0 %v1420_v33 }
  0x42   : > { %1076 = vmatprep.subr.bf16.mxu0 %v1232_v4 }
  0x45   : > { %1077 = vmatpush3.bf16.msra.mxu0 %v1433_v34 }
  0x46   : > { %1078 = vmatprep.subr.bf16.mxu0 %v1232_v4 }
  0x49   : > { %1079 = vmatpush3.bf16.msra.mxu0 %v1440_v35 }
  0x4a   : > { %1104 = vmatprep.subr.bf16.mxu0 %v1232_v4 }
  0xec   : > { %v367_v43 = vpop.f32.mrf.mxu0 }
  0xed   : > { %v368_v44 = vadd.f32 %v367_v43, %v246_v41 }
  0xee   : > { %v369_v45 = vpop.f32.mrf.mxu0 }
  0xef   : > { %v374_v46 = vmax.f32 %v368_v44, 0.0  ;;  %v370_v47 = vadd.f32 %v369_v45, %v250_v42 }
  0xf0   : > { %v371_v48 = vpop.f32.mrf.mxu0 }
  0xf1   : > { %v1452_v50 = vpack.c.bf16 %v374_v46, %v374_v46  ;;  %v375_v51 = vmax.f32 %v370_v47, 0.0 }
  0xf2   : > { %v372_v52 = vpop.f32.mrf.mxu0 }
  0xf3   : > { %v377_v53 = vpack.c.bf16 %v375_v51, %v375_v51  ;;  %1061 = vmatmul.mubr.bf16.vlgmr.msra.gmra.mxu1 %v1452_v50  ;;  %v393_v2 = vshll.u32 %v1452_v50, 16  ;;  %v391_v5 = vshrl.u32 %v1452_v50, 16 }
  0xf4   : > { %1085 = vmatpush3.bf16.msra.mxu1 %v1450_v49  ;;  %1100 = vmatprep.mubr.msk.bf16.mxu1 %vm1233_vm0, %v1232_v4 }
  0xf5   : > { %1086 = vmatprep.subr.bf16.mxu1 %v1232_v4  ;;  %v379_v55 = vshrl.u32 %v377_v53, 16  ;;  %v382_v57 = vshll.u32 %v377_v53, 16  ;;  %v395_v3 = vrot.slane %v393_v2, 1 }
  0xf7   : > { %v381_v56 = vrot.slane %v379_v55, 7  ;;  %v396_v6 = vor.u32 %v395_v3, %v391_v5 }
  0xf8   : > { %1087 = vmatpush3.bf16.msra.mxu1 %v1215_v54 }
  0xf9   : > { %1088 = vmatprep.subr.bf16.mxu1 %v1232_v4  ;;  %v384_v59 = vor.u32 %v382_v57, %v381_v56  ;;  %v401_v7 = vsel %vm400_vm6, %v396_v6, 0 }
  0xfb   : > { %v389_v60 = vsel %vm388_vm3, 0, %v384_v59 }
  0xfc   : > { %1089 = vmatpush3.bf16.msra.mxu1 %v1217_v58  ;;  %1081 = vmatmul.mubr.bf16.vlgmr.msra.gmra.mxu0 %v389_v60 }
  0xfd   : > { %1105 = vmatpush3.bf16.msra.mxu0 %v1300_v10  ;;  %1090 = vmatprep.subr.bf16.mxu1 %v1232_v4 }
  0xfe   : > { %1106 = vmatprep.subr.bf16.mxu0 %v1232_v4  ;;  %1120 = vmatprep.mubr.msk.bf16.mxu0 %vm1233_vm0, %v1232_v4 }
 0x100   : > { %1091 = vmatpush3.bf16.msra.mxu1 %v1218_v61 }
 0x101   : > { %1107 = vmatpush3.bf16.msra.mxu0 %v1309_v12  ;;  %1092 = vmatprep.subr.bf16.mxu1 %v1232_v4 }
 0x102   : > { %1108 = vmatprep.subr.bf16.mxu0 %v1232_v4 }
 0x104   : > { %1093 = vmatpush3.bf16.msra.mxu1 %v1219_v62 }
 0x105   : > { %1109 = vmatpush3.bf16.msra.mxu0 %v1324_v15  ;;  %1094 = vmatprep.subr.bf16.mxu1 %v1232_v4 }
 0x106   : > { %1110 = vmatprep.subr.bf16.mxu0 %v1232_v4 }
 0x108   : > { %1095 = vmatpush3.bf16.msra.mxu1 %v1220_v63 }
 0x109   : > { %1111 = vmatpush3.bf16.msra.mxu0 %v1341_v19  ;;  %1096 = vmatprep.subr.bf16.mxu1 %v1232_v4 }
 0x10a   : > { %1112 = vmatprep.subr.bf16.mxu0 %v1232_v4 }
 0x10c   : > { %1097 = vmatpush3.bf16.msra.mxu1 %v1221_v0 }
 0x10d   : > { %1113 = vmatpush3.bf16.msra.mxu0 %v1353_v21  ;;  %1098 = vmatprep.subr.bf16.mxu1 %v1232_v4 }
 0x10e   : > { %1114 = vmatprep.subr.bf16.mxu0 %v1232_v4 }
 0x110   : > { %1099 = vmatpush3.bf16.msra.mxu1 %v1222_v1 }
 0x111   : > { %1115 = vmatpush3.bf16.msra.mxu0 %v1363_v24  ;;  %1124 = vmatprep.subr.bf16.mxu1 %v1232_v4 }
 0x112   : > { %1116 = vmatprep.subr.bf16.mxu0 %v1232_v4 }
 0x113   : > { %1101 = vmatmul.mubr.bf16.vlgmr.msra.gmra.mxu1 %v377_v53 }
 0x114   : > { %1125 = vmatpush3.bf16.msra.mxu1 %v1370_v26  ;;  %1140 = vmatprep.mubr.msk.bf16.mxu1 %vm1233_vm0, %v1232_v4 }
 0x115   : > { %1117 = vmatpush3.bf16.msra.mxu0 %v1377_v27  ;;  %1126 = vmatprep.subr.bf16.mxu1 %v1232_v4 }
 0x116   : > { %1118 = vmatprep.subr.bf16.mxu0 %v1232_v4 }
 0x118   : > { %1127 = vmatpush3.bf16.msra.mxu1 %v1384_v28 }
 0x119   : > { %1119 = vmatpush3.bf16.msra.mxu0 %v1414_v32  ;;  %1128 = vmatprep.subr.bf16.mxu1 %v1232_v4 }
 0x11a   : > { %1144 = vmatprep.subr.bf16.mxu0 %v1232_v4 }
 0x11c   : > { %1121 = vmatmul.mubr.bf16.vlgmr.msra.gmra.mxu0 %v377_v53  ;;  %1129 = vmatpush3.bf16.msra.mxu1 %v1393_v29 }
 0x11d   : > { %1145 = vmatpush3.bf16.msra.mxu0 %v1450_v49  ;;  %1130 = vmatprep.subr.bf16.mxu1 %v1232_v4 }
 0x11e   : > { %1146 = vmatprep.subr.bf16.mxu0 %v1232_v4  ;;  %1160 = vmatprep.mubr.msk.bf16.mxu0 %vm1233_vm0, %v1232_v4 }
 0x120   : > { %1131 = vmatpush3.bf16.msra.mxu1 %v1400_v30 }
 0x121   : > { %1147 = vmatpush3.bf16.msra.mxu0 %v1215_v54  ;;  %1132 = vmatprep.subr.bf16.mxu1 %v1232_v4 }
 0x122   : > { %1148 = vmatprep.subr.bf16.mxu0 %v1232_v4 }
 0x124   : > { %1133 = vmatpush3.bf16.msra.mxu1 %v1408_v31 }
 0x125   : > { %1149 = vmatpush3.bf16.msra.mxu0 %v1217_v58  ;;  %1134 = vmatprep.subr.bf16.mxu1 %v1232_v4 }
 0x126   : > { %1150 = vmatprep.subr.bf16.mxu0 %v1232_v4 }
 0x128   : > { %1135 = vmatpush3.bf16.msra.mxu1 %v1420_v33 }
 0x129   : > { %1151 = vmatpush3.bf16.msra.mxu0 %v1218_v61  ;;  %1136 = vmatprep.subr.bf16.mxu1 %v1232_v4 }
 0x12a   : > { %1152 = vmatprep.subr.bf16.mxu0 %v1232_v4 }
 0x12c   : > { %1137 = vmatpush3.bf16.msra.mxu1 %v1433_v34 }
 0x12d   : > { %1153 = vmatpush3.bf16.msra.mxu0 %v1219_v62  ;;  %1138 = vmatprep.subr.bf16.mxu1 %v1232_v4 }
 0x12e   : > { %1154 = vmatprep.subr.bf16.mxu0 %v1232_v4 }
 0x130   : > { %1139 = vmatpush3.bf16.msra.mxu1 %v1440_v35 }
 0x131   : > { %1155 = vmatpush3.bf16.msra.mxu0 %v1220_v63 }
 0x132   : > { %1156 = vmatprep.subr.bf16.mxu0 %v1232_v4 }
 0x133   : > { %1141 = vmatmul.mubr.bf16.vlgmr.msra.gmra.mxu1 %v1452_v50 }
 0x135   : > { %1157 = vmatpush3.bf16.msra.mxu0 %v1221_v0 }
 0x136   : > { %1158 = vmatprep.subr.bf16.mxu0 %v1232_v4 }
 0x139   : > { %1159 = vmatpush3.bf16.msra.mxu0 %v1222_v1 }
 0x13c   : > { %1161 = vmatmul.mubr.bf16.vlgmr.msra.gmra.mxu0 %v401_v7 }
 0x1b3   : > { %v535_v8 = vpop.f32.mrf.mxu1 }
 0x1b5   : > { %v1062_v9 = vpop.f32.mrf.mxu1 }
 0x1b7   : > { %v538_v10 = vpop.f32.mrf.mxu1 }
 0x1b9   : > { %v1063_v11 = vpop.f32.mrf.mxu1 }
 0x1bc   : > { %v623_v12 = vpop.f32.mrf.mxu0 }
 0x1bd   : > { %v624_v16 = vadd.f32 %v623_v12, %v535_v8 }
 0x1be   : > { %v1082_v13 = vpop.f32.mrf.mxu0 }
 0x1c0   : > { %v626_v14 = vpop.f32.mrf.mxu0 }
 0x1c2   : > { %v1083_v15 = vpop.f32.mrf.mxu0 }
 0x1d3   : > { %v711_v4 = vpop.f32.mrf.mxu1 }
 0x1d4   : > { %v717_v18 = vadd.f32 %v711_v4, %v624_v16 }
 0x1d5   : > { %v1102_v19 = vpop.f32.mrf.mxu1 }
 0x1d6   : > { %v724_v20 = vadd.f32 %v985_v17, %v717_v18 }
 0x1d7   : > { %v714_v21 = vpop.f32.mrf.mxu1 }
 0x1d8   : > { %847 = vst [vmem:[%s221_s17] sm:$0xff] %v724_v20 }
 0x1d9   : > { %v1103_v22 = vpop.f32.mrf.mxu1 }
 0x1dc   : > { %v759_v23 = vpop.f32.mrf.mxu0 }
 0x1de   : > { %v1122_v24 = vpop.f32.mrf.mxu0 }
 0x1e0   : > { %v762_v25 = vpop.f32.mrf.mxu0 }
 0x1e2   : > { %v1123_v26 = vpop.f32.mrf.mxu0 }
 0x1f3   : > { %v799_v27 = vpop.f32.mrf.mxu1 }
 0x1f4   : > { %v800_v31 = vadd.f32 %v799_v27, %v759_v23 }
 0x1f5   : > { %v1142_v28 = vpop.f32.mrf.mxu1 }
 0x1f7   : > { %v802_v29 = vpop.f32.mrf.mxu1 }
 0x1f9   : > { %v1143_v30 = vpop.f32.mrf.mxu1 }
 0x1fc   : > { %v839_v32 = vpop.f32.mrf.mxu0 }
 0x1fd   : > { %v845_v33 = vadd.f32 %v839_v32, %v800_v31 }
 0x1fe   : > { %v1162_v34 = vpop.f32.mrf.mxu0 }
 0x1ff   : > { %v846_v35 = vadd.f32 %v985_v17, %v845_v33 }
 0x200   : > { %v842_v36 = vpop.f32.mrf.mxu0 }
 0x201   : > { %986 = vst [vmem:[%s221_s17 + $0x8] sm:$0xff] %v846_v35 }
 0x202   : > { %v1163_v37 = vpop.f32.mrf.mxu0 }
 0x203 PF: > { %s15_s18 = sadd.s32 1, %s1229_s18  }
 0x204   : > { %p12_p4 = scmp.ge.s32.totalorder %s15_s18, 4  }
 0x206   :  { %14 = sbr.rel (!%p12_p4) target bundleno = 1 (0x1), region = 73 }

</bundles_post_ra>
